<compile_context>
chip_gen: v5e
topology: v5e:2x2
jax: 0.10.0
libtpu: 0.0.40
codegen_flags: <defaults>
</compile_context>

<pallas_src>
import math
import numpy as np
import jax
import jax.numpy as jnp
from jax.experimental import pallas as pl
from jax.experimental.pallas import tpu as pltpu


# ----------------------------------------------------------------------------
# Fused Pallas kernel: patch-embed -> input_proj -> all-scale bilinear resize
# ----------------------------------------------------------------------------
def _fused_dino_kernel(patches_ref, pw_ref, pb_ref, qw_ref, qb_ref,
                       wallT_ref, o_ref):
    # patches: (1, N, 768) bf16  flattened 16x16x3 patches for one image
    # pw:      (768, 384) bf16   synthetic backbone patch-embed weight
    # pb:      (1, 384)   f32    patch-embed bias
    # qw:      (384, 256) bf16   input_proj (1x1 conv) weight
    # qb:      (1, 256)   f32    input_proj bias
    # wallT:   (N, Npad)  bf16   concat of 4 bilinear kron weights (transposed,
    #                            zero-padded to a multiple of 128 columns)
    # o:       (1, 256, Npad) f32  channels-first multi-scale feature slab
    patches = patches_ref[0]                                   # (N, 768) bf16

    # Backbone patch embed: bf16 MXU, f32 accumulation, f32 bias add.
    tok = jnp.dot(patches, pw_ref[...],
                  preferred_element_type=jnp.float32)          # (N, 384) f32
    tok = tok + pb_ref[...]

    # input_proj 1x1 conv == per-token linear.
    proj = jnp.dot(tok.astype(jnp.bfloat16), qw_ref[...],
                   preferred_element_type=jnp.float32)         # (N, 256) f32
    proj = proj + qb_ref[...]

    # All 4 bilinear resizes in one matmul, emitted channels-first so the host
    # never transposes: out[c, j] = sum_n proj[n, c] * W_all[j, n].
    projT = proj.T.astype(jnp.bfloat16)                        # (256, N)
    out = jnp.dot(projT, wallT_ref[...],
                  preferred_element_type=jnp.float32)          # (256, Npad)
    o_ref[0] = out.astype(o_ref.dtype)


def fused_dino_call(patches_bf16, pw, pb, qw, qb, wallT):
    B, N, K = patches_bf16.shape
    C_embed = pw.shape[1]      # 384
    C_out = qw.shape[1]        # 256
    Npad = wallT.shape[1]
    return pl.pallas_call(
        _fused_dino_kernel,
        out_shape=jax.ShapeDtypeStruct((B, C_out, Npad), jnp.float32),
        grid=(B,),
        in_specs=[
            pl.BlockSpec((1, N, K), lambda b: (b, 0, 0)),
            pl.BlockSpec((K, C_embed), lambda b: (0, 0)),
            pl.BlockSpec((1, C_embed), lambda b: (0, 0)),
            pl.BlockSpec((C_embed, C_out), lambda b: (0, 0)),
            pl.BlockSpec((1, C_out), lambda b: (0, 0)),
            pl.BlockSpec((N, Npad), lambda b: (0, 0)),
        ],
        out_specs=pl.BlockSpec((1, C_out, Npad), lambda b: (b, 0, 0)),
        compiler_params=pltpu.CompilerParams(
            dimension_semantics=("parallel",)),   # megacore-shard over batch
    )(patches_bf16, pw, pb, qw, qb, wallT)


# ----------------------------------------------------------------------------
# Host-side helpers (resize-weight construction, params)
# ----------------------------------------------------------------------------
def bilinear_weights_1d(in_size, out_size, scale_factor):
    """PyTorch F.interpolate(mode='bilinear', align_corners=False) weights,
    matching the scale_factor (not size=) code path."""
    r = 1.0 / scale_factor
    w = np.zeros((out_size, in_size), dtype=np.float32)
    for dst in range(out_size):
        src = (dst + 0.5) * r - 0.5
        src = max(src, 0.0)
        i0 = min(int(np.floor(src)), in_size - 1)
        i1 = min(i0 + 1, in_size - 1)
        w1 = src - i0
        w0 = 1.0 - w1
        w[dst, i0] += w0
        w[dst, i1] += w1
    return w


def build_resize_weights(hw):
    """Concatenate the 4 per-scale kron(Lh, Lw) matrices, pad the output rows
    to a multiple of 128 and transpose -> (hw*hw, Npad) for the fused kernel."""
    blocks, sizes = [], []
    for i in range(4):
        sf = 1.0 / (2 ** i)
        out_hw = int(np.floor(hw * sf))
        l1d = bilinear_weights_1d(hw, out_hw, sf)
        blocks.append(np.kron(l1d, l1d))          # (out_hw^2, hw^2), row-major
        sizes.append(out_hw)
    w_all = np.concatenate(blocks, axis=0)        # (sum out^2, hw^2)
    ntot = w_all.shape[0]
    npad = ((ntot + 127) // 128) * 128
    w_pad = np.zeros((npad, hw * hw), dtype=np.float32)
    w_pad[:ntot] = w_all
    return np.ascontiguousarray(w_pad.T), sizes   # (hw^2, npad)


def init_params(key):
    k1, k2, k3, k4, k5 = jax.random.split(key, 5)
    return {
        # synthetic backbone: patch embed (16*16*3 -> 384) (+ CLS, see note)
        "patch_w": jax.random.normal(k1, (16 * 16 * 3, 384), jnp.float32) * 0.02,
        "patch_b": jax.random.normal(k2, (384,), jnp.float32) * 0.02,
        "cls":     jax.random.normal(k3, (384,), jnp.float32) * 0.02,
        # self.input_proj = nn.Conv2d(384, 256, kernel_size=1)
        "proj_w":  jax.random.normal(k4, (384, 256), jnp.float32) * 0.02,
        "proj_b":  jax.random.normal(k5, (256,), jnp.float32) * 0.02,
    }


# ----------------------------------------------------------------------------
# Forward pass (Pallas equivalent of DinoV2ForDINONEW.forward)
# ----------------------------------------------------------------------------
def dino_forward(params, x):
    B, C, H, W = x.shape
    P = 16
    gh, gw = H // P, W // P
    N = gh * gw

    # Synthetic DINOv2-style backbone front-end: NCHW -> per-patch flattened
    # (c, ph, pw) rows, row-major over (gh, gw).  The CLS token the backbone
    # would prepend is statically dropped by the `feat.size(1) > H//16*W//16`
    # branch before it could affect anything, so it is never materialized.
    patches = (x.reshape(B, C, gh, P, gw, P)
                 .transpose(0, 2, 4, 1, 3, 5)
                 .reshape(B, N, C * P * P)
                 .astype(jnp.bfloat16))

    hw = math.isqrt(N)
    wallT_np, sizes = build_resize_weights(hw)
    wallT = jnp.asarray(wallT_np, jnp.bfloat16)

    # One fused kernel per image: patch-embed + 1x1-conv proj + 4 resizes.
    out = fused_dino_call(
        patches,
        params["patch_w"].astype(jnp.bfloat16),
        params["patch_b"].reshape(1, -1),            # f32 bias
        params["proj_w"].astype(jnp.bfloat16),
        params["proj_b"].reshape(1, -1),             # f32 bias
        wallT,
    )  # (B, 256, Npad) channels-first multi-scale slab

    nested_feats = []
    off = 0
    for out_hw in sizes:
        n = out_hw * out_hw
        # Pure slice + reshape (already channels-first; no transposes needed).
        scaled = out[:, :, off:off + n].reshape(B, 256, out_hw, out_hw)
        # mask is all-False zeros; nearest-interp of zeros is zeros.
        mask = jnp.zeros((B, out_hw, out_hw), dtype=jnp.bool_)
        nested_feats.append((scaled, mask))          # NestedTensor(scaled, mask)
        off += n
    return nested_feats, None


# ----------------------------------------------------------------------------
if __name__ == "__main__":
    key = jax.random.PRNGKey(0)
    pkey, xkey = jax.random.split(key)
    params = init_params(pkey)

    # Small input consistent with the module: B=2, C=3, H=W=128
    # -> 8x8 = 64 patch tokens, hw=8, scales 8/4/2/1.
    x = jax.random.normal(xkey, (2, 3, 128, 128), jnp.float32)

    feats, extra = jax.jit(dino_forward)(params, x)
    for scaled, mask in feats:
        jax.block_until_ready(scaled)
        jax.block_until_ready(mask)

    # sanity: shapes match PyTorch semantics
    expected = [(2, 256, 8, 8), (2, 256, 4, 4), (2, 256, 2, 2), (2, 256, 1, 1)]
    assert [tuple(f.shape) for f, _ in feats] == expected
    assert [tuple(m.shape) for _, m in feats] == [(2, 8, 8), (2, 4, 4), (2, 2, 2), (2, 1, 1)]
    assert extra is None

    print("KERNEL_OK")
</pallas_src>

<mosaic_0001>
module attributes {stable_mosaic.version = 11 : i64} {
  func.func @_fused_dino_kernel(%arg0: i32, %arg1: memref<1x64x768xbf16, #tpu.memory_space<vmem>>, %arg2: memref<768x384xbf16, #tpu.memory_space<vmem>>, %arg3: memref<1x384xf32, #tpu.memory_space<vmem>>, %arg4: memref<384x256xbf16, #tpu.memory_space<vmem>>, %arg5: memref<1x256xf32, #tpu.memory_space<vmem>>, %arg6: memref<64x128xbf16, #tpu.memory_space<vmem>>, %arg7: memref<1x256x128xf32, #tpu.memory_space<vmem>>) attributes {dimension_semantics = [#tpu.dimension_semantics<parallel>], iteration_bounds = array<i64: 2>, scalar_prefetch = 0 : i64, scratch_operands = 0 : i64, tpu.core_type = #tpu.core_type<tc>, window_params = [{transform_indices = @transform_0, window_bounds = array<i64: 1, 64, 768>}, {pipeline_mode = #tpu.pipeline_mode<synchronous>, transform_indices = @transform_1, window_bounds = array<i64: 768, 384>}, {pipeline_mode = #tpu.pipeline_mode<synchronous>, transform_indices = @transform_2, window_bounds = array<i64: 1, 384>}, {pipeline_mode = #tpu.pipeline_mode<synchronous>, transform_indices = @transform_3, window_bounds = array<i64: 384, 256>}, {pipeline_mode = #tpu.pipeline_mode<synchronous>, transform_indices = @transform_4, window_bounds = array<i64: 1, 256>}, {pipeline_mode = #tpu.pipeline_mode<synchronous>, transform_indices = @transform_5, window_bounds = array<i64: 64, 128>}, {transform_indices = @transform_6, window_bounds = array<i64: 1, 256, 128>}]} {
    %c0 = arith.constant 0 : index
    %c0_0 = arith.constant 0 : index
    %c0_1 = arith.constant 0 : index
    %0 = vector.load %arg1[%c0, %c0_0, %c0_1] : memref<1x64x768xbf16, #tpu.memory_space<vmem>>, vector<1x64x768xbf16>
    %1 = vector.shape_cast %0 : vector<1x64x768xbf16> to vector<64x768xbf16>
    %c0_2 = arith.constant 0 : index
    %c0_3 = arith.constant 0 : index
    %2 = vector.load %arg2[%c0_2, %c0_3] : memref<768x384xbf16, #tpu.memory_space<vmem>>, vector<768x384xbf16>
    %cst = arith.constant dense<0.000000e+00> : vector<64x384xf32>
    %3 = tpu.matmul %1, %2, %cst {dimension_numbers = #tpu.dot_dimension_numbers<[1], [0], [0], [1], [0, 0, 1, 1], [], []>} : vector<64x768xbf16>, vector<768x384xbf16>, vector<64x384xf32> -> vector<64x384xf32>
    %c0_4 = arith.constant 0 : index
    %c0_5 = arith.constant 0 : index
    %4 = vector.load %arg3[%c0_4, %c0_5] : memref<1x384xf32, #tpu.memory_space<vmem>>, vector<1x384xf32>
    %5 = vector.broadcast %4 : vector<1x384xf32> to vector<64x384xf32>
    %6 = arith.addf %3, %5 : vector<64x384xf32>
    %7 = arith.truncf %6 : vector<64x384xf32> to vector<64x384xbf16>
    %c0_6 = arith.constant 0 : index
    %c0_7 = arith.constant 0 : index
    %8 = vector.load %arg4[%c0_6, %c0_7] : memref<384x256xbf16, #tpu.memory_space<vmem>>, vector<384x256xbf16>
    %cst_8 = arith.constant dense<0.000000e+00> : vector<64x256xf32>
    %9 = tpu.matmul %7, %8, %cst_8 {dimension_numbers = #tpu.dot_dimension_numbers<[1], [0], [0], [1], [0, 0, 1, 1], [], []>} : vector<64x384xbf16>, vector<384x256xbf16>, vector<64x256xf32> -> vector<64x256xf32>
    %c0_9 = arith.constant 0 : index
    %c0_10 = arith.constant 0 : index
    %10 = vector.load %arg5[%c0_9, %c0_10] : memref<1x256xf32, #tpu.memory_space<vmem>>, vector<1x256xf32>
    %11 = vector.broadcast %10 : vector<1x256xf32> to vector<64x256xf32>
    %12 = arith.addf %9, %11 : vector<64x256xf32>
    %13 = tpu.transpose %12, [1, 0] : vector<64x256xf32> -> vector<256x64xf32>
    %14 = arith.truncf %13 : vector<256x64xf32> to vector<256x64xbf16>
    %c0_11 = arith.constant 0 : index
    %c0_12 = arith.constant 0 : index
    %15 = vector.load %arg6[%c0_11, %c0_12] : memref<64x128xbf16, #tpu.memory_space<vmem>>, vector<64x128xbf16>
    %cst_13 = arith.constant dense<0.000000e+00> : vector<256x128xf32>
    %16 = tpu.matmul %14, %15, %cst_13 {dimension_numbers = #tpu.dot_dimension_numbers<[1], [0], [0], [1], [0, 0, 1, 1], [], []>} : vector<256x64xbf16>, vector<64x128xbf16>, vector<256x128xf32> -> vector<256x128xf32>
    %c0_14 = arith.constant 0 : index
    %c0_15 = arith.constant 0 : index
    %c0_16 = arith.constant 0 : index
    %17 = vector.load %arg7[%c0_14, %c0_15, %c0_16] : memref<1x256x128xf32, #tpu.memory_space<vmem>>, vector<1x256x128xf32>
    %18 = vector.shape_cast %17 : vector<1x256x128xf32> to vector<256x128xf32>
    %19 = vector.shape_cast %16 : vector<256x128xf32> to vector<1x256x128xf32>
    tpu.vector_store %arg7[%c0_14, %c0_15, %c0_16], %19 {strides = array<i32>} : memref<1x256x128xf32, #tpu.memory_space<vmem>>, vector<1x256x128xf32>,
    return
  }
  func.func @transform_0(%arg0: i32) -> (i32, i32, i32) {
    %c0_i32 = arith.constant 0 : i32
    %c0_i32_0 = arith.constant 0 : i32
    %c0_i32_1 = arith.constant 0 : i32
    return %arg0, %c0_i32, %c0_i32_0 : i32, i32, i32
  }
  func.func @transform_1(%arg0: i32) -> (i32, i32) {
    %c0_i32 = arith.constant 0 : i32
    %c0_i32_0 = arith.constant 0 : i32
    %c0_i32_1 = arith.constant 0 : i32
    return %c0_i32, %c0_i32_0 : i32, i32
  }
  func.func @transform_2(%arg0: i32) -> (i32, i32) {
    %c0_i32 = arith.constant 0 : i32
    %c0_i32_0 = arith.constant 0 : i32
    %c0_i32_1 = arith.constant 0 : i32
    return %c0_i32, %c0_i32_0 : i32, i32
  }
  func.func @transform_3(%arg0: i32) -> (i32, i32) {
    %c0_i32 = arith.constant 0 : i32
    %c0_i32_0 = arith.constant 0 : i32
    %c0_i32_1 = arith.constant 0 : i32
    return %c0_i32, %c0_i32_0 : i32, i32
  }
  func.func @transform_4(%arg0: i32) -> (i32, i32) {
    %c0_i32 = arith.constant 0 : i32
    %c0_i32_0 = arith.constant 0 : i32
    %c0_i32_1 = arith.constant 0 : i32
    return %c0_i32, %c0_i32_0 : i32, i32
  }
  func.func @transform_5(%arg0: i32) -> (i32, i32) {
    %c0_i32 = arith.constant 0 : i32
    %c0_i32_0 = arith.constant 0 : i32
    %c0_i32_1 = arith.constant 0 : i32
    return %c0_i32, %c0_i32_0 : i32, i32
  }
  func.func @transform_6(%arg0: i32) -> (i32, i32, i32) {
    %c0_i32 = arith.constant 0 : i32
    %c0_i32_0 = arith.constant 0 : i32
    %c0_i32_1 = arith.constant 0 : i32
    return %arg0, %c0_i32, %c0_i32_0 : i32, i32, i32
  }
}

</mosaic_0001>

<bundles_post_ra>
// kernel: dino_forward.1
= control target key start
LH: loop header
LB: loop body
LE: loop exit
PB: predicated region body
PF: predicated region fallthrough
CT: control target
= control target key end

     0   :  { %s3884_s21 = smov 0   ;;  %s5590_s0 = inlined_call_operand.vmem [shape: bf16[2,64,768], index: 0, kind: input, shape index: {}]   ;;  %s5591_s1 = inlined_call_operand.vmem [shape: bf16[768,384], index: 1, kind: input, shape index: {}]   ;;  %s5592_s2 = inlined_call_operand.vmem [shape: f32[1,384], index: 2, kind: input, shape index: {}]   ;;  %s5593_s3 = inlined_call_operand.vmem [shape: bf16[384,256], index: 3, kind: input, shape index: {}]   ;;  %s5594_s4 = inlined_call_operand.vmem [shape: f32[1,256], index: 4, kind: input, shape index: {}]   ;;  %s5595_s5 = inlined_call_operand.vmem [shape: bf16[64,128], index: 5, kind: input, shape index: {}]   ;;  %s5596_s6 = inlined_call_operand.vmem [shape: f32[2,256,128], index: 6, kind: output, shape index: {}]  }
   0x1 LB: > { %s2704_s22 = sadd.s32 4294967295, %s3847_s21   ;;  %p2708_p0 = scmp.ge.s32.totalorder %s3847_s21, 1  ;;  %s3847_s21 = sphi %s3884_s21, %s16_s21  }
   0x2   : > { %p212_p1 = scmp.lt.s32.totalorder %s3847_s21, 3 }
   0x4   : > { %p213_p2 = pnand %p2708_p0, %p212_p1 }
   0x5   : > { %p242_p3 = scmp.lt.s32.totalorder (!%p213_p2), %s2704_s22, 1 }
   0x6   : > { %216 = sbr.rel (%p213_p2) target bundleno = 1181 (0x49d), region = 44 }
   0xb   : > { %v2894_v0 = vld [vmem:[%s5591_s1 + $0xa8] sm:$0xf]  ;;  %v3657_v1 = vld [vmem:[%s5591_s1 + $0xb0] sm:$0xf0]  ;;  %v2882_v9 = vld [vmem:[%s5591_s1 + $0x90] sm:$0xf] }
   0xc   : > { %v3086_v2 = vld [vmem:[%s5591_s1 + $0x228] sm:$0xf]  ;;  %v2895_v3 = vor.u32 %v3657_v1, %v2894_v0  ;;  %v3705_v4 = vld [vmem:[%s5591_s1 + $0x230] sm:$0xf0]  ;;  %v3654_v10 = vld [vmem:[%s5591_s1 + $0x98] sm:$0xf0] }
   0xd   : > { %v3182_v5 = vld [vmem:[%s5591_s1 + $0x2e8] sm:$0xf]  ;;  %v3729_v6 = vld [vmem:[%s5591_s1 + $0x2f0] sm:$0xf0]  ;;  %v3087_v7 = vor.u32 %v3705_v4, %v3086_v2  ;;  %v3074_v11 = vld [vmem:[%s5591_s1 + $0x210] sm:$0xf]  ;;  %v2883_v12 = vor.u32 %v3654_v10, %v2882_v9 }
   0xe   : > { %v3183_v8 = vor.u32 %v3729_v6, %v3182_v5  ;;  %1365 = vmatpush.bf16.msra.mxu1 %v2895_v3  ;;  %v3702_v13 = vld [vmem:[%s5591_s1 + $0x218] sm:$0xf0]  ;;  %v3170_v14 = vld [vmem:[%s5591_s1 + $0x2d0] sm:$0xf]  ;;  %v2870_v18 = vld [vmem:[%s5591_s1 + $0x78] sm:$0xf] }
   0xf   : > { %v3726_v15 = vld [vmem:[%s5591_s1 + $0x2d8] sm:$0xf0]  ;;  %1423 = vmatpush.bf16.msra.mxu2 %v3087_v7  ;;  %v3075_v16 = vor.u32 %v3702_v13, %v3074_v11  ;;  %v3651_v19 = vld [vmem:[%s5591_s1 + $0x80] sm:$0xf0]  ;;  %v3062_v20 = vld [vmem:[%s5591_s1 + $0x1f8] sm:$0xf] }
  0x10   : > { %1452 = vmatpush.bf16.msra.mxu3 %v3183_v8  ;;  %v3171_v17 = vor.u32 %v3726_v15, %v3170_v14  ;;  %v3699_v21 = vld [vmem:[%s5591_s1 + $0x200] sm:$0xf0]  ;;  %v3158_v22 = vld [vmem:[%s5591_s1 + $0x2b8] sm:$0xf]  ;;  %v2871_v24 = vor.u32 %v3651_v19, %v2870_v18  ;;  %v2858_v27 = vld [vmem:[%s5591_s1 + $0x60] sm:$0xf] }
  0x11   : > { %v3723_v23 = vld [vmem:[%s5591_s1 + $0x2c0] sm:$0xf0]  ;;  %v3063_v25 = vor.u32 %v3699_v21, %v3062_v20  ;;  %v3648_v28 = vld [vmem:[%s5591_s1 + $0x68] sm:$0xf0]  ;;  %v3050_v29 = vld [vmem:[%s5591_s1 + $0x1e0] sm:$0xf] }
  0x12   : > { %1366 = vmatpush.bf16.msra.mxu1 %v2883_v12  ;;  %v3159_v26 = vor.u32 %v3723_v23, %v3158_v22  ;;  %v3696_v30 = vld [vmem:[%s5591_s1 + $0x1e8] sm:$0xf0]  ;;  %v3146_v31 = vld [vmem:[%s5591_s1 + $0x2a0] sm:$0xf]  ;;  %v2859_v33 = vor.u32 %v3648_v28, %v2858_v27  ;;  %v2846_v36 = vld [vmem:[%s5591_s1 + $0x48] sm:$0xf] }
  0x13   : > { %1424 = vmatpush.bf16.msra.mxu2 %v3075_v16  ;;  %v3720_v32 = vld [vmem:[%s5591_s1 + $0x2a8] sm:$0xf0]  ;;  %v3051_v34 = vor.u32 %v3696_v30, %v3050_v29  ;;  %v3645_v37 = vld [vmem:[%s5591_s1 + $0x50] sm:$0xf0]  ;;  %v3038_v38 = vld [vmem:[%s5591_s1 + $0x1c8] sm:$0xf] }
  0x14   : > { %1453 = vmatpush.bf16.msra.mxu3 %v3171_v17  ;;  %v3147_v35 = vor.u32 %v3720_v32, %v3146_v31  ;;  %v3693_v39 = vld [vmem:[%s5591_s1 + $0x1d0] sm:$0xf0]  ;;  %v3134_v40 = vld [vmem:[%s5591_s1 + $0x288] sm:$0xf]  ;;  %v2847_v42 = vor.u32 %v3645_v37, %v2846_v36  ;;  %v2834_v43 = vld [vmem:[%s5591_s1 + $0x30] sm:$0xf] }
  0x15   : > { %v3717_v41 = vld [vmem:[%s5591_s1 + $0x290] sm:$0xf0]  ;;  %v3039_v44 = vor.u32 %v3693_v39, %v3038_v38  ;;  %v3642_v46 = vld [vmem:[%s5591_s1 + $0x38] sm:$0xf0]  ;;  %v3026_v47 = vld [vmem:[%s5591_s1 + $0x1b0] sm:$0xf] }
  0x16   : > { %1367 = vmatpush.bf16.msra.mxu1 %v2871_v24  ;;  %v3135_v45 = vor.u32 %v3717_v41, %v3134_v40  ;;  %v3690_v48 = vld [vmem:[%s5591_s1 + $0x1b8] sm:$0xf0]  ;;  %v3122_v49 = vld [vmem:[%s5591_s1 + $0x270] sm:$0xf]  ;;  %s5598_s22 = smov (!%p242_p3, %s2704_s22), 1  ;;  %v2835_v51 = vor.u32 %v3642_v46, %v2834_v43  ;;  %vm2479_vm0 = vcmask 523264  }
  0x17   : > { %1425 = vmatpush.bf16.msra.mxu2 %v3063_v25  ;;  %v3714_v50 = vld [vmem:[%s5591_s1 + $0x278] sm:$0xf0]  ;;  %v2822_v52 = vld [vmem:[%s5591_s1 + $0x18] sm:$0xf]  ;;  %v3027_v53 = vor.u32 %v3690_v48, %v3026_v47  ;;  %v3639_v55 = vld [vmem:[%s5591_s1 + $0x20] sm:$0xf0] }
  0x18   : > { %1454 = vmatpush.bf16.msra.mxu3 %v3159_v26  ;;  %v3123_v54 = vor.u32 %v3714_v50, %v3122_v49  ;;  %v3014_v56 = vld [vmem:[%s5591_s1 + $0x198] sm:$0xf]  ;;  %s3831_s11 = smul.u32 192, %s5598_s22  ;;  %v3687_v57 = vld [vmem:[%s5591_s1 + $0x1a0] sm:$0xf0]  ;;  %v2823_v60 = vor.u32 %v3639_v55, %v2822_v52  ;;  %s3610_s30 = sshll.u32 %s5598_s22, 8 }
  0x19   : > { %v3110_v58 = vld [vmem:[%s5591_s1 + $0x258] sm:$0xf]  ;;  %v3711_v59 = vld [vmem:[%s5591_s1 + $0x260] sm:$0xf0]  ;;  %v3015_v61 = vor.u32 %v3687_v57, %v3014_v56  ;;  %v2810_v63 = vld [vmem:[%s5591_s1] sm:$0xf]  ;;  %s5545_s9 = scalar_lea.vmem %s5596_s6, %s3610_s30 }
  0x1a   : > { %1368 = vmatpush.bf16.msra.mxu1 %v2859_v33  ;;  %v3111_v62 = vor.u32 %v3711_v59, %v3110_v58  ;;  %v3636_v0 = vld [vmem:[%s5591_s1 + $0x8] sm:$0xf0]  ;;  %v3002_v1 = vld [vmem:[%s5591_s1 + $0x180] sm:$0xf]  ;;  %s4037_s28 = scalar_lea.vmem %s5590_s0, %s3831_s11  ;;  %v2990_v5 = vld [vmem:[%s5591_s1 + $0x168] sm:$0xf] }
  0x1b   : > { %1426 = vmatpush.bf16.msra.mxu2 %v3051_v34  ;;  %v3684_v2 = vld [vmem:[%s5591_s1 + $0x188] sm:$0xf0]  ;;  %v3098_v3 = vld [vmem:[%s5591_s1 + $0x240] sm:$0xf]  ;;  %v3681_v6 = vld [vmem:[%s5591_s1 + $0x170] sm:$0xf0]  ;;  %v2811_v7 = vor.u32 %v3636_v0, %v2810_v63 }
  0x1c   : > { %1455 = vmatpush.bf16.msra.mxu3 %v3147_v35  ;;  %v3708_v4 = vld [vmem:[%s5591_s1 + $0x248] sm:$0xf0]  ;;  %v2714_v8 = vld [vmem:[%s4037_s28] sm:$0xf]  ;;  %v3614_v9 = vld [vmem:[%s4037_s28 + $0x14] sm:$0xf0]  ;;  %v3003_v11 = vor.u32 %v3684_v2, %v3002_v1  ;;  %v2991_v16 = vor.u32 %v3681_v6, %v2990_v5 }
  0x1d   : > { %v2722_v10 = vld [vmem:[%s4037_s28 + $0x8] sm:$0xf]  ;;  %v3099_v12 = vor.u32 %v3708_v4, %v3098_v3  ;;  %v3615_v13 = vld [vmem:[%s4037_s28 + $0x1c] sm:$0xf0]  ;;  %v3612_v14 = vld [vmem:[%s4037_s28 + $0xc] sm:$0xf]  ;;  %v4060_v17 = vor.u32 %v3614_v9, %v2714_v8 }
  0x1e   : > { %1369 = vmatpush.bf16.msra.mxu1 %v2847_v42  ;;  %v2724_v15 = vld [vmem:[%s4037_s28 + $0x20] sm:$0xf0]  ;;  %v2978_v18 = vld [vmem:[%s5591_s1 + $0x150] sm:$0xf]  ;;  %v3678_v19 = vld [vmem:[%s5591_s1 + $0x158] sm:$0xf0]  ;;  %v4068_v20 = vor.u32 %v3615_v13, %v2722_v10 }
  0x1f   : > { %1427 = vmatpush.bf16.msra.mxu2 %v3039_v44  ;;  %v4070_v21 = vor.u32 %v3612_v14, %v2724_v15  ;;  %v2979_v22 = vor.u32 %v3678_v19, %v2978_v18  ;;  %v3278_v23 = vld [vmem:[%s5591_s1 + $0x3a8] sm:$0xf]  ;;  %v3753_v24 = vld [vmem:[%s5591_s1 + $0x3b0] sm:$0xf0]  ;;  %v2966_v25 = vld [vmem:[%s5591_s1 + $0x138] sm:$0xf] }
  0x20   : > { %1456 = vmatpush.bf16.msra.mxu3 %v3135_v45  ;;  %v3675_v26 = vld [vmem:[%s5591_s1 + $0x140] sm:$0xf0]  ;;  %v3279_v27 = vor.u32 %v3753_v24, %v3278_v23  ;;  %v3680_v28 = vld [vmem:[%s5591_s1 + $0x16c] sm:$0xf]  ;;  %v2992_v29 = vld [vmem:[%s5591_s1 + $0x174] sm:$0xf0] }
  0x21   : > { %v2995_v30 = vor.u32 %v3680_v28, %v2992_v29  ;;  %v3266_v31 = vld [vmem:[%s5591_s1 + $0x390] sm:$0xf]  ;;  %v3750_v32 = vld [vmem:[%s5591_s1 + $0x398] sm:$0xf0]  ;;  %v3677_v33 = vld [vmem:[%s5591_s1 + $0x154] sm:$0xf]  ;;  %v2967_v34 = vor.u32 %v3675_v26, %v2966_v25 }
  0x22   : > { %1370 = vmatpush.bf16.msra.mxu1 %v2835_v51  ;;  %v2954_v35 = vld [vmem:[%s5591_s1 + $0x120] sm:$0xf]  ;;  %v3267_v36 = vor.u32 %v3750_v32, %v3266_v31  ;;  %v3672_v38 = vld [vmem:[%s5591_s1 + $0x128] sm:$0xf0]  ;;  %v3254_v40 = vld [vmem:[%s5591_s1 + $0x378] sm:$0xf] }
  0x23   : > { %1428 = vmatpush.bf16.msra.mxu2 %v3027_v53  ;;  %v2980_v37 = vld [vmem:[%s5591_s1 + $0x15c] sm:$0xf0]  ;;  %v3747_v41 = vld [vmem:[%s5591_s1 + $0x380] sm:$0xf0]  ;;  %v3674_v42 = vld [vmem:[%s5591_s1 + $0x13c] sm:$0xf]  ;;  %v2955_v46 = vor.u32 %v3672_v38, %v2954_v35 }
  0x24   : > { %1457 = vmatpush.bf16.msra.mxu3 %v3123_v54  ;;  %v2983_v39 = vor.u32 %v3677_v33, %v2980_v37  ;;  %v2968_v43 = vld [vmem:[%s5591_s1 + $0x144] sm:$0xf0]  ;;  %v3255_v44 = vor.u32 %v3747_v41, %v3254_v40  ;;  %v2738_v45 = vld [vmem:[%s4037_s28 + $0x30] sm:$0xf]  ;;  %v3242_v47 = vld [vmem:[%s5591_s1 + $0x360] sm:$0xf] }
  0x25   : > { %v3744_v48 = vld [vmem:[%s5591_s1 + $0x368] sm:$0xf0]  ;;  %v3620_v49 = vld [vmem:[%s4037_s28 + $0x44] sm:$0xf0]  ;;  %v3669_v51 = vld [vmem:[%s5591_s1 + $0x110] sm:$0xf0]  ;;  %v2971_v52 = vor.u32 %v3674_v42, %v2968_v43 }
  0x26   : > { %1371 = vmatpush.bf16.msra.mxu1 %v2823_v60  ;;  %v2942_v50 = vld [vmem:[%s5591_s1 + $0x108] sm:$0xf]  ;;  %v2746_v53 = vld [vmem:[%s4037_s28 + $0x38] sm:$0xf]  ;;  %v3671_v54 = vld [vmem:[%s5591_s1 + $0x124] sm:$0xf]  ;;  %v3243_v59 = vor.u32 %v3744_v48, %v3242_v47 }
  0x27   : > { %1429 = vmatpush.bf16.msra.mxu2 %v3015_v61  ;;  %v2956_v55 = vld [vmem:[%s5591_s1 + $0x12c] sm:$0xf0]  ;;  %v3618_v57 = vld [vmem:[%s4037_s28 + $0x3c] sm:$0xf]  ;;  %v2748_v58 = vld [vmem:[%s4037_s28 + $0x50] sm:$0xf0]  ;;  %v2943_v60 = vor.u32 %v3669_v51, %v2942_v50  ;;  %v4147_v61 = vor.u32 %v3620_v49, %v2738_v45 }
  0x28   : > { %1458 = vmatpush.bf16.msra.mxu3 %v3111_v62  ;;  %v3621_v56 = vld [vmem:[%s4037_s28 + $0x4c] sm:$0xf0]  ;;  %v3666_v63 = vld [vmem:[%s5591_s1 + $0xf8] sm:$0xf0]  ;;  %v2959_v0 = vor.u32 %v3671_v54, %v2956_v55  ;;  %v4157_v2 = vor.u32 %v3618_v57, %v2748_v58  ;;  %v3230_v4 = vld [vmem:[%s5591_s1 + $0x348] sm:$0xf] }
  0x29   : > { %v2930_v62 = vld [vmem:[%s5591_s1 + $0xf0] sm:$0xf]  ;;  %v4155_v1 = vor.u32 %v3621_v56, %v2746_v53  ;;  %v3741_v5 = vld [vmem:[%s5591_s1 + $0x350] sm:$0xf0]  ;;  %v2918_v6 = vld [vmem:[%s5591_s1 + $0xd8] sm:$0xf] }
  0x2a   : > { %1372 = vmatpush.bf16.msra.mxu1 %v2811_v7  ;;  %v2931_v3 = vor.u32 %v3666_v63, %v2930_v62  ;;  %v3663_v7 = vld [vmem:[%s5591_s1 + $0xe0] sm:$0xf0]  ;;  %v3231_v8 = vor.u32 %v3741_v5, %v3230_v4  ;;  %v3668_v9 = vld [vmem:[%s5591_s1 + $0x10c] sm:$0xf]  ;;  %v2944_v10 = vld [vmem:[%s5591_s1 + $0x114] sm:$0xf0] }
  0x2b   : > { %1430 = vmatpush.bf16.msra.mxu2 %v3003_v11  ;;  %v2947_v11 = vor.u32 %v3668_v9, %v2944_v10  ;;  %v3738_v13 = vld [vmem:[%s5591_s1 + $0x338] sm:$0xf0]  ;;  %v3665_v14 = vld [vmem:[%s5591_s1 + $0xf4] sm:$0xf]  ;;  %v2919_v15 = vor.u32 %v3663_v7, %v2918_v6  ;;  %v2932_v18 = vld [vmem:[%s5591_s1 + $0xfc] sm:$0xf0] }
  0x2c   : > { %1459 = vmatpush.bf16.msra.mxu3 %v3099_v12  ;;  %v3218_v12 = vld [vmem:[%s5591_s1 + $0x330] sm:$0xf]  ;;  %v2906_v19 = vld [vmem:[%s5591_s1 + $0xc0] sm:$0xf]  ;;  %v3660_v23 = vld [vmem:[%s5591_s1 + $0xc8] sm:$0xf0] }
  0x2d   : > { %1373 = vmatmul.bf16.vlgmr.msra.gmra.mxu1 %v4060_v17  ;;  %v3206_v24 = vld [vmem:[%s5591_s1 + $0x318] sm:$0xf]  ;;  %v3735_v25 = vld [vmem:[%s5591_s1 + $0x320] sm:$0xf0]  ;;  %v3662_v26 = vld [vmem:[%s5591_s1 + $0xdc] sm:$0xf]  ;;  %v2907_v29 = vor.u32 %v3660_v23, %v2906_v19 }
  0x2e   : > { %1394 = vmatpush.bf16.msrb.mxu1 %v2991_v16  ;;  %1431 = vmatmul.bf16.vlgmr.msra.gmra.mxu2 %v4068_v20  ;;  %v3219_v16 = vor.u32 %v3738_v13, %v3218_v12  ;;  %v3207_v28 = vor.u32 %v3735_v25, %v3206_v24  ;;  %v3732_v31 = vld [vmem:[%s5591_s1 + $0x308] sm:$0xf0]  ;;  %v2762_v32 = vld [vmem:[%s4037_s28 + $0x60] sm:$0xf]  ;;  %v3626_v33 = vld [vmem:[%s4037_s28 + $0x74] sm:$0xf0] }
  0x2f   : > { %1460 = vmatmul.bf16.vlgmr.msra.gmra.mxu3 %v4070_v21  ;;  %1481 = vmatpush.bf16.msrb.mxu2 %v3279_v27  ;;  %v2920_v27 = vld [vmem:[%s5591_s1 + $0xe4] sm:$0xf0]  ;;  %v2908_v37 = vld [vmem:[%s5591_s1 + $0xcc] sm:$0xf0]  ;;  %v3627_v38 = vld [vmem:[%s4037_s28 + $0x7c] sm:$0xf0]  ;;  %v4228_v42 = vor.u32 %v3626_v33, %v2762_v32 }
  0x30   : > { %1568 = vmatpush.bf16.msrb.mxu3 %v2995_v30  ;;  %v3194_v30 = vld [vmem:[%s5591_s1 + $0x300] sm:$0xf]  ;;  %v2770_v35 = vld [vmem:[%s4037_s28 + $0x68] sm:$0xf]  ;;  %v2772_v40 = vld [vmem:[%s4037_s28 + $0x80] sm:$0xf0] }
  0x31   : > { %v3195_v41 = vor.u32 %v3732_v31, %v3194_v30  ;;  %v3777_v47 = vld [vmem:[%s5591_s1 + $0x470] sm:$0xf0]  ;;  %v3362_v48 = vld [vmem:[%s5591_s1 + $0x450] sm:$0xf]  ;;  %v3774_v50 = vld [vmem:[%s5591_s1 + $0x458] sm:$0xf0] }
  0x32   : > { %1395 = vmatpush.bf16.msrb.mxu1 %v2979_v22  ;;  %v2935_v22 = vor.u32 %v3665_v14, %v2932_v18  ;;  %v3363_v51 = vor.u32 %v3774_v50, %v3362_v48  ;;  %v3632_v53 = vld [vmem:[%s4037_s28 + $0xa4] sm:$0xf0]  ;;  %v2794_v54 = vld [vmem:[%s4037_s28 + $0x98] sm:$0xf]  ;;  %v3633_v55 = vld [vmem:[%s4037_s28 + $0xac] sm:$0xf0] }
  0x33   : > { %1482 = vmatpush.bf16.msrb.mxu2 %v3267_v36  ;;  %v3659_v36 = vld [vmem:[%s5591_s1 + $0xc4] sm:$0xf]  ;;  %v3630_v56 = vld [vmem:[%s4037_s28 + $0x9c] sm:$0xf]  ;;  %v2796_v57 = vld [vmem:[%s4037_s28 + $0xb0] sm:$0xf0] }
  0x34   : > { %1569 = vmatpush.bf16.msrb.mxu3 %v2983_v39  ;;  %v3624_v39 = vld [vmem:[%s4037_s28 + $0x6c] sm:$0xf]  ;;  %v2911_v43 = vor.u32 %v3659_v36, %v2908_v37  ;;  %v3350_v62 = vld [vmem:[%s5591_s1 + $0x438] sm:$0xf]  ;;  %v3771_v63 = vld [vmem:[%s5591_s1 + $0x440] sm:$0xf0] }
  0x35   : > { %v4232_v45 = vor.u32 %v3624_v39, %v2772_v40  ;;  %v3768_v4 = vld [vmem:[%s5591_s1 + $0x428] sm:$0xf0]  ;;  %v3611_v6 = vld [vmem:[%s4037_s28 + $0x4] sm:$0xf]  ;;  %v2716_v7 = vld [vmem:[%s4037_s28 + $0x18] sm:$0xf0] }
  0x36   : > { %1396 = vmatpush.bf16.msrb.mxu1 %v2967_v34  ;;  %v2923_v34 = vor.u32 %v3662_v26, %v2920_v27  ;;  %v3616_v9 = vld [vmem:[%s4037_s28 + $0x24] sm:$0xf0]  ;;  %v4280_v10 = vor.u32 %v3611_v6, %v2716_v7  ;;  %v3656_v12 = vld [vmem:[%s5591_s1 + $0xac] sm:$0xf]  ;;  %v2896_v13 = vld [vmem:[%s5591_s1 + $0xb4] sm:$0xf0] }
  0x37   : > { %1483 = vmatpush.bf16.msrb.mxu2 %v3255_v44  ;;  %v4230_v44 = vor.u32 %v3627_v38, %v2770_v35  ;;  %v2899_v14 = vor.u32 %v3656_v12, %v2896_v13  ;;  %v3704_v18 = vld [vmem:[%s5591_s1 + $0x22c] sm:$0xf]  ;;  %v3653_v23 = vld [vmem:[%s5591_s1 + $0x94] sm:$0xf]  ;;  %v2884_v24 = vld [vmem:[%s5591_s1 + $0x9c] sm:$0xf0] }
  0x38   : > { %1570 = vmatpush.bf16.msrb.mxu3 %v2971_v52  ;;  %v2786_v52 = vld [vmem:[%s4037_s28 + $0x90] sm:$0xf]  ;;  %v2887_v26 = vor.u32 %v3653_v23, %v2884_v24  ;;  %v3701_v27 = vld [vmem:[%s5591_s1 + $0x214] sm:$0xf]  ;;  %v3762_v30 = vld [vmem:[%s5591_s1 + $0x3f8] sm:$0xf0] }
  0x39   : > { %v4255_v58 = vor.u32 %v3632_v53, %v2786_v52  ;;  %v3650_v31 = vld [vmem:[%s5591_s1 + $0x7c] sm:$0xf]  ;;  %v2872_v32 = vld [vmem:[%s5591_s1 + $0x84] sm:$0xf0]  ;;  %v3647_v38 = vld [vmem:[%s5591_s1 + $0x64] sm:$0xf] }
  0x3a   : > { %1397 = vmatpush.bf16.msrb.mxu1 %v2955_v46  ;;  %v3374_v46 = vld [vmem:[%s5591_s1 + $0x468] sm:$0xf]  ;;  %v2875_v35 = vor.u32 %v3650_v31, %v2872_v32  ;;  %v3698_v36 = vld [vmem:[%s5591_s1 + $0x1fc] sm:$0xf]  ;;  %v2860_v39 = vld [vmem:[%s5591_s1 + $0x6c] sm:$0xf0] }
  0x3b   : > { %1484 = vmatpush.bf16.msrb.mxu2 %v3243_v59  ;;  %v3375_v49 = vor.u32 %v3777_v47, %v3374_v46  ;;  %v4257_v59 = vor.u32 %v3633_v55, %v2794_v54  ;;  %v3064_v37 = vld [vmem:[%s5591_s1 + $0x204] sm:$0xf0]  ;;  %v3617_v40 = vld [vmem:[%s4037_s28 + $0x34] sm:$0xf]  ;;  %v2754_v46 = vld [vmem:[%s4037_s28 + $0x40] sm:$0xf]  ;;  %v2863_v48 = vor.u32 %v3647_v38, %v2860_v39 }
  0x3c   : > { %1571 = vmatpush.bf16.msrb.mxu3 %v2959_v0  ;;  %v3338_v0 = vld [vmem:[%s5591_s1 + $0x420] sm:$0xf]  ;;  %v3622_v47 = vld [vmem:[%s4037_s28 + $0x54] sm:$0xf0]  ;;  %v3052_v50 = vld [vmem:[%s5591_s1 + $0x1ec] sm:$0xf0] }
  0x3d   : > { %1378 = vmatmul.bf16.gmra.mxu1 %v4147_v61  ;;  %v3339_v5 = vor.u32 %v3768_v4, %v3338_v0  ;;  %v4353_v52 = vor.u32 %v3622_v47, %v2754_v46  ;;  %v3644_v54 = vld [vmem:[%s5591_s1 + $0x4c] sm:$0xf]  ;;  %v2848_v55 = vld [vmem:[%s5591_s1 + $0x54] sm:$0xf0]  ;;  %v3641_v4 = vld [vmem:[%s5591_s1 + $0x34] sm:$0xf] }
  0x3e   : > { %1398 = vmatpush.bf16.msrb.mxu1 %v2943_v60  ;;  %1436 = vmatmul.bf16.gmra.mxu2 %v4155_v1  ;;  %v4259_v60 = vor.u32 %v3630_v56, %v2796_v57  ;;  %v2851_v56 = vor.u32 %v3644_v54, %v2848_v55  ;;  %v3302_v57 = vld [vmem:[%s5591_s1 + $0x3d8] sm:$0xf]  ;;  %v3290_v12 = vld [vmem:[%s5591_s1 + $0x3c0] sm:$0xf]  ;;  %v3756_v13 = vld [vmem:[%s5591_s1 + $0x3c8] sm:$0xf0] }
  0x3f   : > { %1465 = vmatmul.bf16.gmra.mxu3 %v4157_v2  ;;  %1485 = vmatpush.bf16.msrb.mxu2 %v3231_v8  ;;  %v2730_v8 = vld [vmem:[%s4037_s28 + $0x10] sm:$0xf]  ;;  %v3016_v23 = vld [vmem:[%s5591_s1 + $0x1a4] sm:$0xf0]  ;;  %v3623_v24 = vld [vmem:[%s4037_s28 + $0x64] sm:$0xf] }
  0x40   : > { %1572 = vmatpush.bf16.msrb.mxu3 %v2947_v11  ;;  %v4282_v11 = vor.u32 %v3616_v9, %v2730_v8  ;;  %v3689_v8 = vld [vmem:[%s5591_s1 + $0x1b4] sm:$0xf]  ;;  %v3028_v9 = vld [vmem:[%s5591_s1 + $0x1bc] sm:$0xf0]  ;;  %v3184_v38 = vld [vmem:[%s5591_s1 + $0x2f4] sm:$0xf0] }
  0x41   : > { %v3629_v46 = vld [vmem:[%s4037_s28 + $0x94] sm:$0xf]  ;;  %v2788_v47 = vld [vmem:[%s4037_s28 + $0xa8] sm:$0xf0]  ;;  %v3722_v54 = vld [vmem:[%s5591_s1 + $0x2bc] sm:$0xf] }
  0x42   : > { %1399 = vmatpush.bf16.msrb.mxu1 %v2931_v3  ;;  %v3351_v3 = vor.u32 %v3771_v63, %v3350_v62  ;;  %v3759_v62 = vld [vmem:[%s5591_s1 + $0x3e0] sm:$0xf0]  ;;  %v3692_v63 = vld [vmem:[%s5591_s1 + $0x1cc] sm:$0xf]  ;;  %v3160_v55 = vld [vmem:[%s5591_s1 + $0x2c4] sm:$0xf0] }
  0x43   : > { %1486 = vmatpush.bf16.msrb.mxu2 %v3219_v16  ;;  %v3765_v16 = vld [vmem:[%s5591_s1 + $0x410] sm:$0xf0]  ;;  %v3303_v0 = vor.u32 %v3759_v62, %v3302_v57  ;;  %v3719_v57 = vld [vmem:[%s5591_s1 + $0x2a4] sm:$0xf]  ;;  %v3148_v62 = vld [vmem:[%s5591_s1 + $0x2ac] sm:$0xf0] }
  0x44   : > { %1573 = vmatpush.bf16.msrb.mxu3 %v2935_v22  ;;  %v3088_v22 = vld [vmem:[%s5591_s1 + $0x234] sm:$0xf0] }
  0x45   : > { %v3091_v25 = vor.u32 %v3704_v18, %v3088_v22  ;;  %v3031_v18 = vor.u32 %v3689_v8, %v3028_v9  ;;  %v3686_v22 = vld [vmem:[%s5591_s1 + $0x19c] sm:$0xf]  ;;  %v3716_v9 = vld [vmem:[%s5591_s1 + $0x28c] sm:$0xf] }
  0x46   : > { %1400 = vmatpush.bf16.msrb.mxu1 %v2919_v15  ;;  %v3326_v15 = vld [vmem:[%s5591_s1 + $0x408] sm:$0xf] }
  0x47   : > { %1487 = vmatpush.bf16.msrb.mxu2 %v3207_v28  ;;  %v3327_v19 = vor.u32 %v3765_v16, %v3326_v15  ;;  %v3076_v28 = vld [vmem:[%s5591_s1 + $0x21c] sm:$0xf0]  ;;  %v2824_v15 = vld [vmem:[%s5591_s1 + $0x24] sm:$0xf0]  ;;  %v3291_v16 = vor.u32 %v3756_v13, %v3290_v12  ;;  %v3136_v12 = vld [vmem:[%s5591_s1 + $0x294] sm:$0xf0] }
  0x48   : > { %1574 = vmatpush.bf16.msrb.mxu3 %v2923_v34  ;;  %v3079_v33 = vor.u32 %v3701_v27, %v3076_v28  ;;  %v3628_v27 = vld [vmem:[%s4037_s28 + $0x84] sm:$0xf0]  ;;  %v3019_v28 = vor.u32 %v3686_v22, %v3016_v23  ;;  %v3776_v13 = vld [vmem:[%s5591_s1 + $0x46c] sm:$0xf] }
  0x4a   : > { %1401 = vmatpush.bf16.msrb.mxu1 %v2907_v29  ;;  %v3314_v29 = vld [vmem:[%s5591_s1 + $0x3f0] sm:$0xf] }
  0x4b   : > { %1488 = vmatpush.bf16.msrb.mxu2 %v3195_v41  ;;  %v3315_v34 = vor.u32 %v3762_v30, %v3314_v29  ;;  %v2740_v41 = vld [vmem:[%s4037_s28 + $0x48] sm:$0xf0]  ;;  %v3635_v29 = vld [vmem:[%s5591_s1 + $0x4] sm:$0xf]  ;;  %v2812_v30 = vld [vmem:[%s5591_s1 + $0xc] sm:$0xf0] }
  0x4c   : > { %1575 = vmatpush.bf16.msrb.mxu3 %v2911_v43  ;;  %v3067_v43 = vor.u32 %v3698_v36, %v3064_v37  ;;  %v2815_v32 = vor.u32 %v3635_v29, %v2812_v30  ;;  %v3728_v37 = vld [vmem:[%s5591_s1 + $0x2ec] sm:$0xf]  ;;  %v3713_v29 = vld [vmem:[%s5591_s1 + $0x274] sm:$0xf]  ;;  %v3124_v30 = vld [vmem:[%s5591_s1 + $0x27c] sm:$0xf0] }
  0x4d   : > { %1383 = vmatmul.bf16.gmra.mxu1 %v4228_v42  ;;  %v3187_v39 = vor.u32 %v3728_v37, %v3184_v38  ;;  %v2756_v37 = vld [vmem:[%s4037_s28 + $0x58] sm:$0xf0] }
  0x4e   : > { %1441 = vmatmul.bf16.gmra.mxu2 %v4230_v44  ;;  %1510 = vmatpush.bf16.msra.mxu1 %v3375_v49  ;;  %v3695_v49 = vld [vmem:[%s5591_s1 + $0x1e4] sm:$0xf] }
  0x4f   : > { %1470 = vmatmul.bf16.gmra.mxu3 %v4232_v45  ;;  %1539 = vmatpush.bf16.msra.mxu2 %v2899_v14  ;;  %v3055_v53 = vor.u32 %v3695_v49, %v3052_v50  ;;  %v3638_v14 = vld [vmem:[%s5591_s1 + $0x1c] sm:$0xf]  ;;  %v3634_v49 = vld [vmem:[%s4037_s28 + $0xb4] sm:$0xf0]  ;;  %v4445_v50 = vor.u32 %v3629_v46, %v2788_v47 }
  0x50   : > { %1597 = vmatpush.bf16.msra.mxu3 %v3091_v25  ;;  %v2764_v25 = vld [vmem:[%s4037_s28 + $0x78] sm:$0xf0] }
  0x51   : > { %v4416_v31 = vor.u32 %v3623_v24, %v2764_v25  ;;  %v3658_v46 = vld [vmem:[%s5591_s1 + $0xb8] sm:$0xf0] }
  0x52   : > { %1511 = vmatpush.bf16.msra.mxu1 %v3363_v51  ;;  %v4351_v51 = vor.u32 %v3617_v40, %v2740_v41  ;;  %v3725_v40 = vld [vmem:[%s5591_s1 + $0x2d4] sm:$0xf]  ;;  %v3172_v41 = vld [vmem:[%s5591_s1 + $0x2dc] sm:$0xf0] }
  0x53   : > { %1540 = vmatpush.bf16.msra.mxu2 %v2887_v26  ;;  %v2778_v26 = vld [vmem:[%s4037_s28 + $0x70] sm:$0xf] }
  0x54   : > { %1598 = vmatpush.bf16.msra.mxu3 %v3079_v33  ;;  %v4418_v33 = vor.u32 %v3628_v27, %v2778_v26  ;;  %v3773_v26 = vld [vmem:[%s5591_s1 + $0x454] sm:$0xf]  ;;  %v3364_v27 = vld [vmem:[%s5591_s1 + $0x45c] sm:$0xf0] }
  0x56   : > { %1512 = vmatpush.bf16.msra.mxu1 %v3351_v3  ;;  %v3040_v3 = vld [vmem:[%s5591_s1 + $0x1d4] sm:$0xf0] }
  0x57   : > { %1541 = vmatpush.bf16.msra.mxu2 %v2875_v35  ;;  %v3043_v6 = vor.u32 %v3692_v63, %v3040_v3  ;;  %v3004_v35 = vld [vmem:[%s5591_s1 + $0x18c] sm:$0xf0]  ;;  %v3151_v63 = vor.u32 %v3719_v57, %v3148_v62  ;;  %v2732_v3 = vld [vmem:[%s4037_s28 + $0x28] sm:$0xf0] }
  0x58   : > { %1599 = vmatpush.bf16.msra.mxu3 %v3067_v43  ;;  %v3175_v43 = vor.u32 %v3725_v40, %v3172_v41  ;;  %v3352_v40 = vld [vmem:[%s5591_s1 + $0x444] sm:$0xf0]  ;;  %v2902_v41 = vld [vmem:[%s5591_s1 + $0xb0] sm:$0xf] }
  0x59   : > { %v2903_v47 = vor.u32 %v3658_v46, %v2902_v41  ;;  %v3649_v41 = vld [vmem:[%s5591_s1 + $0x70] sm:$0xf0]  ;;  %v3100_v46 = vld [vmem:[%s5591_s1 + $0x24c] sm:$0xf0] }
  0x5a   : > { %1513 = vmatpush.bf16.msra.mxu1 %v3339_v5  ;;  %v2836_v5 = vld [vmem:[%s5591_s1 + $0x3c] sm:$0xf0] }
  0x5b   : > { %1542 = vmatpush.bf16.msra.mxu2 %v2863_v48  ;;  %v2839_v7 = vor.u32 %v3641_v4, %v2836_v5  ;;  %v2802_v48 = vld [vmem:[%s4037_s28 + $0xa0] sm:$0xf]  ;;  %1713 = vmatpush.bf16.msra.mxu0 %v2903_v47 }
  0x5c   : > { %1600 = vmatpush.bf16.msra.mxu3 %v3055_v53  ;;  %v4447_v53 = vor.u32 %v3634_v49, %v2802_v48  ;;  %v3743_v48 = vld [vmem:[%s5591_s1 + $0x364] sm:$0xf]  ;;  %v3244_v49 = vld [vmem:[%s5591_s1 + $0x36c] sm:$0xf0] }
  0x5d   : > { %1388 = vmatmul.bf16.gmra.mxu1 %v4255_v58  ;;  %v3247_v57 = vor.u32 %v3743_v48, %v3244_v49  ;;  %v3734_v49 = vld [vmem:[%s5591_s1 + $0x31c] sm:$0xf] }
  0x5e   : > { %1446 = vmatmul.bf16.gmra.mxu2 %v4257_v59  ;;  %1514 = vmatpush.bf16.msra.mxu1 %v3327_v19  ;;  %v2827_v19 = vor.u32 %v3638_v14, %v2824_v15  ;;  %v3139_v14 = vor.u32 %v3716_v9, %v3136_v12  ;;  %v3376_v15 = vld [vmem:[%s5591_s1 + $0x474] sm:$0xf0]  ;;  %v3740_v9 = vld [vmem:[%s5591_s1 + $0x34c] sm:$0xf] }
  0x5f   : > { %1475 = vmatmul.bf16.gmra.mxu3 %v4259_v60  ;;  %1543 = vmatpush.bf16.msra.mxu2 %v2851_v56  ;;  %v3163_v56 = vor.u32 %v3722_v54, %v3160_v55  ;;  %v3232_v12 = vld [vmem:[%s5591_s1 + $0x354] sm:$0xf0] }
  0x60   : > { %1601 = vmatpush.bf16.msra.mxu3 %v3043_v6  ;;  %v3752_v6 = vld [vmem:[%s5591_s1 + $0x3ac] sm:$0xf] }
  0x62   : > { %1515 = vmatpush.bf16.msra.mxu1 %v3315_v34  ;;  %v3683_v34 = vld [vmem:[%s5591_s1 + $0x184] sm:$0xf] }
  0x63   : > { %1544 = vmatpush.bf16.msra.mxu2 %v2839_v7  ;;  %v3007_v36 = vor.u32 %v3683_v34, %v3004_v35  ;;  %v3280_v7 = vld [vmem:[%s5591_s1 + $0x3b4] sm:$0xf0]  ;;  %v3127_v34 = vor.u32 %v3713_v29, %v3124_v30  ;;  %v3256_v35 = vld [vmem:[%s5591_s1 + $0x384] sm:$0xf0]  ;;  %v3737_v29 = vld [vmem:[%s5591_s1 + $0x334] sm:$0xf] }
  0x64   : > { %1602 = vmatpush.bf16.msra.mxu3 %v3031_v18  ;;  %v3283_v8 = vor.u32 %v3752_v6, %v3280_v7  ;;  %v3749_v18 = vld [vmem:[%s5591_s1 + $0x394] sm:$0xf]  ;;  %v3655_v7 = vld [vmem:[%s5591_s1 + $0xa0] sm:$0xf0]  ;;  %v3220_v30 = vld [vmem:[%s5591_s1 + $0x33c] sm:$0xf0] }
  0x66   : > { %1516 = vmatpush.bf16.msra.mxu1 %v3303_v0  ;;  %v3613_v0 = vld [vmem:[%s4037_s28 + $0x14] sm:$0xf] }
  0x67   : > { %1545 = vmatpush.bf16.msra.mxu2 %v2827_v19  ;;  %v4466_v4 = vor.u32 %v3613_v0, %v2732_v3  ;;  %v3268_v19 = vld [vmem:[%s5591_s1 + $0x39c] sm:$0xf0]  ;;  %v3340_v0 = vld [vmem:[%s5591_s1 + $0x42c] sm:$0xf0]  ;;  %v2890_v3 = vld [vmem:[%s5591_s1 + $0x98] sm:$0xf] }
  0x68   : > { %1603 = vmatpush.bf16.msra.mxu3 %v3019_v28  ;;  %v3271_v24 = vor.u32 %v3749_v18, %v3268_v19  ;;  %v3367_v28 = vor.u32 %v3773_v26, %v3364_v27  ;;  %v3328_v19 = vld [vmem:[%s5591_s1 + $0x414] sm:$0xf0]  ;;  %v3652_v26 = vld [vmem:[%s5591_s1 + $0x88] sm:$0xf0] }
  0x6a   : > { %1517 = vmatpush.bf16.msra.mxu1 %v3291_v16  ;;  %v3379_v16 = vor.u32 %v3776_v13, %v3376_v15  ;;  %v3235_v13 = vor.u32 %v3740_v9, %v3232_v12  ;;  %v3112_v15 = vld [vmem:[%s5591_s1 + $0x264] sm:$0xf0]  ;;  %v3646_v12 = vld [vmem:[%s5591_s1 + $0x58] sm:$0xf0] }
  0x6b   : > { %1546 = vmatpush.bf16.msra.mxu2 %v2815_v32  ;;  %v3746_v32 = vld [vmem:[%s5591_s1 + $0x37c] sm:$0xf] }
  0x6c   : > { %1604 = vmatpush.bf16.msra.mxu3 %v3007_v36  ;;  %v3619_v36 = vld [vmem:[%s4037_s28 + $0x44] sm:$0xf]  ;;  %v3259_v38 = vor.u32 %v3746_v32, %v3256_v35  ;;  %v3223_v35 = vor.u32 %v3737_v29, %v3220_v30  ;;  %v2842_v29 = vld [vmem:[%s5591_s1 + $0x38] sm:$0xf] }
  0x6d   : > { %1402 = vmatmul.bf16.vlgmr.msrb.gmra.mxu1 %v4280_v10 }
  0x6e   : > { %1489 = vmatmul.bf16.vlgmr.msrb.gmra.mxu2 %v4282_v11  ;;  %1626 = vmatpush.bf16.msrb.mxu1 %v3187_v39  ;;  %v3770_v39 = vld [vmem:[%s5591_s1 + $0x43c] sm:$0xf] }
  0x6f   : > { %1576 = vmatmul.bf16.vlgmr.msrb.gmra.mxu3 %v4280_v10  ;;  %1655 = vmatpush.bf16.msrb.mxu2 %v3283_v8  ;;  %v2891_v8 = vor.u32 %v3655_v7, %v2890_v3  ;;  %v3304_v7 = vld [vmem:[%s5591_s1 + $0x3e4] sm:$0xf0] }
  0x70   : > { %1684 = vmatpush.bf16.msrb.mxu3 %v3379_v16  ;;  %v3764_v16 = vld [vmem:[%s5591_s1 + $0x40c] sm:$0xf] }
  0x71   : > { %1714 = vmatpush.bf16.msra.mxu0 %v2891_v8  ;;  %v3331_v27 = vor.u32 %v3764_v16, %v3328_v19  ;;  %v2854_v8 = vld [vmem:[%s5591_s1 + $0x50] sm:$0xf] }
  0x72   : > { %1627 = vmatpush.bf16.msrb.mxu1 %v3175_v43  ;;  %v3355_v43 = vor.u32 %v3770_v39, %v3352_v40  ;;  %v2866_v39 = vld [vmem:[%s5591_s1 + $0x68] sm:$0xf] }
  0x73   : > { %1656 = vmatpush.bf16.msrb.mxu2 %v3271_v24  ;;  %v2878_v24 = vld [vmem:[%s5591_s1 + $0x80] sm:$0xf]  ;;  %v2867_v47 = vor.u32 %v3649_v41, %v2866_v39  ;;  %v3682_v39 = vld [vmem:[%s5591_s1 + $0x178] sm:$0xf0] }
  0x74   : > { %1685 = vmatpush.bf16.msrb.mxu3 %v3367_v28  ;;  %v2879_v28 = vor.u32 %v3652_v26, %v2878_v24 }
  0x76   : > { %1628 = vmatpush.bf16.msrb.mxu1 %v3163_v56  ;;  %v4545_v56 = vor.u32 %v3619_v36, %v2756_v37  ;;  %v3761_v37 = vld [vmem:[%s5591_s1 + $0x3f4] sm:$0xf]  ;;  %1715 = vmatpush.bf16.msra.mxu0 %v2879_v28  ;;  %v3292_v28 = vld [vmem:[%s5591_s1 + $0x3cc] sm:$0xf0] }
  0x77   : > { %1657 = vmatpush.bf16.msrb.mxu2 %v3259_v38  ;;  %v3316_v38 = vld [vmem:[%s5591_s1 + $0x3fc] sm:$0xf0] }
  0x78   : > { %1686 = vmatpush.bf16.msrb.mxu3 %v3355_v43  ;;  %v3319_v40 = vor.u32 %v3761_v37, %v3316_v38  ;;  %v3707_v43 = vld [vmem:[%s5591_s1 + $0x244] sm:$0xf]  ;;  %v2998_v38 = vld [vmem:[%s5591_s1 + $0x170] sm:$0xf] }
  0x79   : > { %v3103_v48 = vor.u32 %v3707_v43, %v3100_v46  ;;  %v2999_v41 = vor.u32 %v3682_v39, %v2998_v38  ;;  %v3640_v43 = vld [vmem:[%s5591_s1 + $0x28] sm:$0xf0]  ;;  %v2962_v38 = vld [vmem:[%s5591_s1 + $0x128] sm:$0xf]  ;;  %v3673_v39 = vld [vmem:[%s5591_s1 + $0x130] sm:$0xf0] }
  0x7a   : > { %1629 = vmatpush.bf16.msrb.mxu1 %v3151_v63  ;;  %v3767_v63 = vld [vmem:[%s5591_s1 + $0x424] sm:$0xf]  ;;  %1716 = vmatpush.bf16.msra.mxu0 %v2867_v47 }
  0x7b   : > { %1658 = vmatpush.bf16.msrb.mxu2 %v3247_v57  ;;  %v3343_v6 = vor.u32 %v3767_v63, %v3340_v0  ;;  %v3208_v57 = vld [vmem:[%s5591_s1 + $0x324] sm:$0xf0]  ;;  %v3625_v63 = vld [vmem:[%s4037_s28 + $0x74] sm:$0xf]  ;;  %v2780_v0 = vld [vmem:[%s4037_s28 + $0x88] sm:$0xf0] }
  0x7c   : > { %v3211_v3 = vor.u32 %v3734_v49, %v3208_v57  ;;  %v4648_v19 = vor.u32 %v3625_v63, %v2780_v0  ;;  %v2818_v57 = vld [vmem:[%s5591_s1 + $0x8] sm:$0xf]  ;;  %v3637_v63 = vld [vmem:[%s5591_s1 + $0x10] sm:$0xf0] }
  0x7d   : > { %1407 = vmatmul.bf16.gmra.mxu1 %v4351_v51  ;;  %1687 = vmatpush.bf16.msrb.mxu3 %v3343_v6  ;;  %v3758_v6 = vld [vmem:[%s5591_s1 + $0x3dc] sm:$0xf]  ;;  %v2819_v0 = vor.u32 %v3637_v63, %v2818_v57 }
  0x7e   : > { %1494 = vmatmul.bf16.gmra.mxu2 %v4353_v52  ;;  %1630 = vmatpush.bf16.msrb.mxu1 %v3139_v14  ;;  %v3710_v14 = vld [vmem:[%s5591_s1 + $0x25c] sm:$0xf]  ;;  %v3307_v9 = vor.u32 %v3758_v6, %v3304_v7  ;;  %v3679_v6 = vld [vmem:[%s5591_s1 + $0x160] sm:$0xf0] }
  0x7f   : > { %1581 = vmatmul.bf16.gmra.mxu3 %v4351_v51  ;;  %v3115_v18 = vor.u32 %v3710_v14, %v3112_v15  ;;  %1659 = vmatpush.bf16.msrb.mxu2 %v3235_v13  ;;  %v2855_v13 = vor.u32 %v3646_v12, %v2854_v8  ;;  %v3731_v14 = vld [vmem:[%s5591_s1 + $0x304] sm:$0xf]  ;;  %v3196_v15 = vld [vmem:[%s5591_s1 + $0x30c] sm:$0xf0]  ;;  %v2804_v8 = vld [vmem:[%s4037_s28 + $0xb8] sm:$0xf0] }
  0x80   : > { %v3199_v24 = vor.u32 %v3731_v14, %v3196_v15  ;;  %v3631_v7 = vld [vmem:[%s4037_s28 + $0xa4] sm:$0xf] }
  0x81   : > { %1688 = vmatpush.bf16.msrb.mxu3 %v3331_v27  ;;  %v3755_v27 = vld [vmem:[%s5591_s1 + $0x3c4] sm:$0xf]  ;;  %1717 = vmatpush.bf16.msra.mxu0 %v2855_v13  ;;  %v4703_v14 = vor.u32 %v3631_v7, %v2804_v8  ;;  %v3670_v7 = vld [vmem:[%s5591_s1 + $0x118] sm:$0xf0]  ;;  %v3190_v8 = vld [vmem:[%s5591_s1 + $0x2f0] sm:$0xf] }
  0x82   : > { %1631 = vmatpush.bf16.msrb.mxu1 %v3127_v34  ;;  %v3295_v30 = vor.u32 %v3755_v27, %v3292_v28  ;;  %v3676_v27 = vld [vmem:[%s5591_s1 + $0x148] sm:$0xf0] }
  0x83   : > { %1660 = vmatpush.bf16.msrb.mxu2 %v3223_v35  ;;  %v3643_v35 = vld [vmem:[%s5591_s1 + $0x40] sm:$0xf0] }
  0x84   : > { %v2843_v37 = vor.u32 %v3643_v35, %v2842_v29 }
  0x85   : > { %1689 = vmatpush.bf16.msrb.mxu3 %v3319_v40  ;;  %v2830_v40 = vld [vmem:[%s5591_s1 + $0x20] sm:$0xf] }
  0x86   : > { %1632 = vmatpush.bf16.msrb.mxu1 %v3115_v18  ;;  %1718 = vmatpush.bf16.msra.mxu0 %v2843_v37  ;;  %v2831_v46 = vor.u32 %v3640_v43, %v2830_v40  ;;  %v2963_v40 = vor.u32 %v3673_v39, %v2962_v38  ;;  %v3703_v38 = vld [vmem:[%s5591_s1 + $0x220] sm:$0xf0] }
  0x87   : > { %1661 = vmatpush.bf16.msrb.mxu2 %v3211_v3  ;;  %v2986_v3 = vld [vmem:[%s5591_s1 + $0x158] sm:$0xf] }
  0x89   : > { %1690 = vmatpush.bf16.msrb.mxu3 %v3307_v9  ;;  %v2987_v9 = vor.u32 %v3679_v6, %v2986_v3  ;;  %v3706_v3 = vld [vmem:[%s5591_s1 + $0x238] sm:$0xf0] }
  0x8a   : > { %1633 = vmatpush.bf16.msrb.mxu1 %v3103_v48  ;;  %1719 = vmatpush.bf16.msra.mxu0 %v2831_v46 }
  0x8b   : > { %1662 = vmatpush.bf16.msrb.mxu2 %v3199_v24  ;;  %v2974_v24 = vld [vmem:[%s5591_s1 + $0x140] sm:$0xf] }
  0x8c   : > { %v2975_v28 = vor.u32 %v3676_v27, %v2974_v24  ;;  %v3730_v24 = vld [vmem:[%s5591_s1 + $0x2f8] sm:$0xf0] }
  0x8d   : > { %1412 = vmatmul.bf16.gmra.mxu1 %v4416_v31  ;;  %1691 = vmatpush.bf16.msrb.mxu3 %v3295_v30  ;;  %v3191_v27 = vor.u32 %v3730_v24, %v3190_v8  ;;  %v2938_v8 = vld [vmem:[%s5591_s1 + $0xf8] sm:$0xf] }
  0x8e   : > { %1499 = vmatmul.bf16.gmra.mxu2 %v4418_v33  ;;  %1720 = vmatpush.bf16.msra.mxu0 %v2819_v0  ;;  %v3094_v0 = vld [vmem:[%s5591_s1 + $0x230] sm:$0xf] }
  0x8f   : > { %1586 = vmatmul.bf16.gmra.mxu3 %v4416_v31 }
  0x91   : > { %1721 = vmatmul.bf16.vlgmr.msra.gmra.mxu0 %v4060_v17 }
  0x9d   : > { %1417 = vmatmul.bf16.gmra.mxu1 %v4445_v50 }
  0x9e   : > { %1504 = vmatmul.bf16.gmra.mxu2 %v4447_v53 }
  0x9f   : > { %1591 = vmatmul.bf16.gmra.mxu3 %v4445_v50 }
  0xa1   : > { %1726 = vmatmul.bf16.gmra.mxu0 %v4147_v61 }
  0xaa   : > { %v4468_v5 = vpop.f32.mrf.mxu1 }
  0xad   : > { %1518 = vmatmul.bf16.vlgmr.msra.gmra.mxu1 %v4466_v4 }
  0xae   : > { %1547 = vmatmul.bf16.vlgmr.msra.gmra.mxu2 %v4060_v17  ;;  %1742 = vmatpush.bf16.msra.mxu1 %v2999_v41  ;;  %v4724_v17 = vld [vmem:[%s5592_s2] sm:$0x7] }
  0xaf   : > { %1605 = vmatmul.bf16.vlgmr.msra.gmra.mxu3 %v4068_v20  ;;  %v4729_v37 = vperm.slane %v4724_v17, 0 }
  0xb0   : > { %1800 = vmatpush.bf16.msra.mxu3 %v3191_v27  ;;  %v3166_v27 = vld [vmem:[%s5591_s1 + $0x2c0] sm:$0xf] }
  0xb1   : > { %v4497_v22 = vpop.f32.mrf.mxu2  ;;  %v1375_v41 = vadd.f32 %v4468_v5, %v4729_v37  ;;  %v3095_v5 = vor.u32 %v3706_v3, %v3094_v0  ;;  %v3178_v0 = vld [vmem:[%s5591_s1 + $0x2d8] sm:$0xf]  ;;  %v3727_v3 = vld [vmem:[%s5591_s1 + $0x2e0] sm:$0xf0]  ;;  %1731 = vmatmul.bf16.gmra.mxu0 %v4228_v42 }
  0xb2   : > { %v4499_v23 = vpop.f32.mrf.mxu3  ;;  %v4501_v25 = vpop.f32.mrf.mxu1  ;;  %1743 = vmatpush.bf16.msra.mxu1 %v2987_v9 }
  0xb3   : > { %1771 = vmatpush.bf16.msra.mxu2 %v3095_v5  ;;  %v1377_v39 = vadd.f32 %v4501_v25, %v4729_v37  ;;  %v3179_v25 = vor.u32 %v3727_v3, %v3178_v0  ;;  %v3070_v5 = vld [vmem:[%s5591_s1 + $0x200] sm:$0xf]  ;;  %v3697_v0 = vld [vmem:[%s5591_s1 + $0x1f0] sm:$0xf0] }
  0xb5   : > { %1801 = vmatpush.bf16.msra.mxu3 %v3179_v25 }
  0xb6   : > { %1744 = vmatpush.bf16.msra.mxu1 %v2975_v28  ;;  %v3082_v28 = vld [vmem:[%s5591_s1 + $0x218] sm:$0xf] }
  0xb9   : > { %v4541_v54 = vpop.f32.mrf.mxu2 }
  0xba   : > { %v4543_v55 = vpop.f32.mrf.mxu3  ;;  %v4547_v62 = vpop.f32.mrf.mxu1  ;;  %1745 = vmatpush.bf16.msra.mxu1 %v2963_v40 }
  0xbb   : > { %v1380_v3 = vadd.f32 %v4547_v62, %v4729_v37  ;;  %v3274_v62 = vld [vmem:[%s5591_s1 + $0x398] sm:$0xf] }
  0xbd   : > { %1523 = vmatmul.bf16.gmra.mxu1 %v4545_v56 }
  0xbe   : > { %1552 = vmatmul.bf16.gmra.mxu2 %v4147_v61  ;;  %v2950_v61 = vld [vmem:[%s5591_s1 + $0x110] sm:$0xf] }
  0xbf   : > { %1610 = vmatmul.bf16.gmra.mxu3 %v4155_v1  ;;  %v2951_v9 = vor.u32 %v3670_v7, %v2950_v61  ;;  %v3700_v61 = vld [vmem:[%s5591_s1 + $0x208] sm:$0xf0] }
  0xc1   : > { %v4594_v32 = vpop.f32.mrf.mxu2  ;;  %1746 = vmatpush.bf16.msra.mxu1 %v2951_v9  ;;  %v3071_v9 = vor.u32 %v3700_v61, %v3070_v5  ;;  %1736 = vmatmul.bf16.gmra.mxu0 %v4255_v58 }
  0xc2   : > { %v4596_v34 = vpop.f32.mrf.mxu3  ;;  %v4598_v36 = vpop.f32.mrf.mxu1 }
  0xc9   : > { %v4644_v16 = vpop.f32.mrf.mxu2 }
  0xca   : > { %v4646_v18 = vpop.f32.mrf.mxu3  ;;  %v4650_v26 = vpop.f32.mrf.mxu1 }
  0xcd   : > { %1528 = vmatmul.bf16.gmra.mxu1 %v4648_v19 }
  0xce   : > { %1557 = vmatmul.bf16.gmra.mxu2 %v4228_v42  ;;  %v3751_v42 = vld [vmem:[%s5591_s1 + $0x3a0] sm:$0xf0] }
  0xcf   : > { %1615 = vmatmul.bf16.gmra.mxu3 %v4230_v44 }
  0xd1   : > { %v4679_v47 = vpop.f32.mrf.mxu2 }
  0xd2   : > { %v4681_v48 = vpop.f32.mrf.mxu3  ;;  %v4683_v49 = vpop.f32.mrf.mxu1 }
  0xd9   : > { %v4699_v12 = vpop.f32.mrf.mxu2 }
  0xda   : > { %v4701_v13 = vpop.f32.mrf.mxu3  ;;  %v4705_v15 = vpop.f32.mrf.mxu1 }
  0xdd   : > { %1533 = vmatmul.bf16.gmra.mxu1 %v4703_v14 }
  0xde   : > { %1562 = vmatmul.bf16.gmra.mxu2 %v4255_v58  ;;  %v3739_v58 = vld [vmem:[%s5591_s1 + $0x340] sm:$0xf0] }
  0xdf   : > { %1620 = vmatmul.bf16.gmra.mxu3 %v4257_v59 }
  0xe1   : > { %v4717_v29 = vpop.f32.mrf.mxu2 }
  0xe2   : > { %v4719_v30 = vpop.f32.mrf.mxu3  ;;  %v4726_v35 = vpop.f32.mrf.mxu1 }
  0xe9   : > { %v4739_v43 = vpop.f32.mrf.mxu2 }
  0xea   : > { %v4741_v46 = vpop.f32.mrf.mxu3  ;;  %v1403_v57 = vpop.f32.mrf.mxu1 }
  0xeb   : > { %v1404_v63 = vadd.f32 %v1403_v57, %v1375_v41  ;;  %v3083_v41 = vor.u32 %v3703_v38, %v3082_v28  ;;  %v3724_v28 = vld [vmem:[%s5591_s1 + $0x2c8] sm:$0xf0] }
  0xed   : > { %v1433_v6 = vadd.f32 %v4497_v22, %v1404_v63  ;;  %1634 = vmatmul.bf16.vlgmr.msrb.gmra.mxu1 %v4070_v21  ;;  %1772 = vmatpush.bf16.msra.mxu2 %v3083_v41 }
  0xee   : > { %1663 = vmatmul.bf16.vlgmr.msrb.gmra.mxu2 %v4282_v11 }
  0xef   : > { %1692 = vmatmul.bf16.vlgmr.msrb.gmra.mxu3 %v4466_v4  ;;  %v1462_v22 = vadd.f32 %v4499_v23, %v1433_v6 }
  0xf1   : > { %v1490_v40 = vpop.f32.mrf.mxu2  ;;  %1773 = vmatpush.bf16.msra.mxu2 %v3071_v9 }
  0xf2   : > { %v4775_v23 = vpop.f32.mrf.mxu3  ;;  %v4777_v57 = vadd.f32 %v1490_v40, %v1462_v22  ;;  %v1405_v63 = vpop.f32.mrf.mxu1  ;;  %v3667_v22 = vld [vmem:[%s5591_s1 + $0x100] sm:$0xf0]  ;;  %v3754_v40 = vld [vmem:[%s5591_s1 + $0x3b8] sm:$0xf0] }
  0xf3   : > { %v1406_v6 = vadd.f32 %v1405_v63, %v1377_v39  ;;  %v2939_v24 = vor.u32 %v3667_v22, %v2938_v8  ;;  %v3167_v39 = vor.u32 %v3724_v28, %v3166_v27  ;;  %v3058_v63 = vld [vmem:[%s5591_s1 + $0x1e8] sm:$0xf]  ;;  %v3721_v8 = vld [vmem:[%s5591_s1 + $0x2b0] sm:$0xf0]  ;;  %v3046_v27 = vld [vmem:[%s5591_s1 + $0x1d0] sm:$0xf] }
  0xf4   : > { %v3059_v25 = vor.u32 %v3697_v0, %v3058_v63  ;;  %v3694_v28 = vld [vmem:[%s5591_s1 + $0x1d8] sm:$0xf0] }
  0xf5   : > { %v1435_v7 = vadd.f32 %v4541_v54, %v1406_v6  ;;  %v3286_v54 = vld [vmem:[%s5591_s1 + $0x3b0] sm:$0xf]  ;;  %1747 = vmatpush.bf16.msra.mxu1 %v2939_v24  ;;  %1802 = vmatpush.bf16.msra.mxu3 %v3167_v39  ;;  %v3275_v24 = vor.u32 %v3751_v42, %v3274_v62  ;;  %v2926_v39 = vld [vmem:[%s5591_s1 + $0xe0] sm:$0xf]  ;;  %v3718_v0 = vld [vmem:[%s5591_s1 + $0x298] sm:$0xf0] }
  0xf6   : > { %v3287_v41 = vor.u32 %v3754_v40, %v3286_v54  ;;  %1774 = vmatpush.bf16.msra.mxu2 %v3059_v25  ;;  %v3664_v40 = vld [vmem:[%s5591_s1 + $0xe8] sm:$0xf0] }
  0xf7   : > { %v1464_v38 = vadd.f32 %v4543_v55, %v1435_v7  ;;  %v3154_v7 = vld [vmem:[%s5591_s1 + $0x2a8] sm:$0xf]  ;;  %v2927_v63 = vor.u32 %v3664_v40, %v2926_v39  ;;  %v3745_v39 = vld [vmem:[%s5591_s1 + $0x370] sm:$0xf0] }
  0xf8   : > { %1829 = vmatpush.bf16.msrb.mxu0 %v3287_v41  ;;  %v3155_v9 = vor.u32 %v3721_v8, %v3154_v7  ;;  %v3142_v41 = vld [vmem:[%s5591_s1 + $0x290] sm:$0xf]  ;;  %v3691_v7 = vld [vmem:[%s5591_s1 + $0x1c0] sm:$0xf0]  ;;  %v1382_v8 = vadd.f32 %v4598_v36, %v4729_v37  ;;  %v3250_v36 = vld [vmem:[%s5591_s1 + $0x368] sm:$0xf] }
  0xf9   : > { %v1492_v55 = vpop.f32.mrf.mxu2  ;;  %v3143_v25 = vor.u32 %v3718_v0, %v3142_v41  ;;  %1748 = vmatpush.bf16.msra.mxu1 %v2927_v63  ;;  %v3251_v40 = vor.u32 %v3745_v39, %v3250_v36  ;;  %v3022_v41 = vld [vmem:[%s5591_s1 + $0x1a0] sm:$0xf]  ;;  %v2914_v0 = vld [vmem:[%s5591_s1 + $0xc8] sm:$0xf] }
  0xfa   : > { %v4819_v6 = vpop.f32.mrf.mxu3  ;;  %v4821_v5 = vadd.f32 %v1492_v55, %v1464_v38  ;;  %v1408_v61 = vpop.f32.mrf.mxu1  ;;  %v3047_v38 = vor.u32 %v3694_v28, %v3046_v27  ;;  %1803 = vmatpush.bf16.msra.mxu3 %v3155_v9  ;;  %v3748_v55 = vld [vmem:[%s5591_s1 + $0x388] sm:$0xf0]  ;;  %v3130_v27 = vld [vmem:[%s5591_s1 + $0x278] sm:$0xf]  ;;  %v3715_v28 = vld [vmem:[%s5591_s1 + $0x280] sm:$0xf0] }
  0xfb   : > { %v1409_v22 = vadd.f32 %v1408_v61, %v1380_v3  ;;  %v3262_v3 = vld [vmem:[%s5591_s1 + $0x380] sm:$0xf] }
  0xfc   : > { %1830 = vmatpush.bf16.msrb.mxu0 %v3275_v24  ;;  %1775 = vmatpush.bf16.msra.mxu2 %v3047_v38  ;;  %v3263_v61 = vor.u32 %v3748_v55, %v3262_v3  ;;  %v3131_v38 = vor.u32 %v3715_v28, %v3130_v27  ;;  %v3661_v3 = vld [vmem:[%s5591_s1 + $0xd0] sm:$0xf0] }
  0xfd   : > { %v1438_v54 = vadd.f32 %v4594_v32, %v1409_v22  ;;  %1639 = vmatmul.bf16.gmra.mxu1 %v4157_v2  ;;  %v3685_v27 = vld [vmem:[%s5591_s1 + $0x190] sm:$0xf0] }
  0xfe   : > { %1668 = vmatmul.bf16.gmra.mxu2 %v4353_v52  ;;  %1804 = vmatpush.bf16.msra.mxu3 %v3143_v25  ;;  %v2915_v25 = vor.u32 %v3661_v3, %v2914_v0 }
  0xff   : > { %1697 = vmatmul.bf16.gmra.mxu3 %v4545_v56  ;;  %v1467_v32 = vadd.f32 %v4596_v34, %v1438_v54  ;;  %v3034_v34 = vld [vmem:[%s5591_s1 + $0x1b8] sm:$0xf] }
 0x100   : > { %v3035_v9 = vor.u32 %v3691_v7, %v3034_v34  ;;  %1831 = vmatpush.bf16.msrb.mxu0 %v3263_v61  ;;  %v3118_v61 = vld [vmem:[%s5591_s1 + $0x260] sm:$0xf]  ;;  %v3712_v34 = vld [vmem:[%s5591_s1 + $0x268] sm:$0xf0]  ;;  %1749 = vmatpush.bf16.msra.mxu1 %v2915_v25  ;;  %v3778_v25 = vld [vmem:[%s5591_s1 + $0x478] sm:$0xf0] }
 0x101   : > { %v1495_v62 = vpop.f32.mrf.mxu2 }
 0x102   : > { %v4873_v22 = vpop.f32.mrf.mxu3  ;;  %v4875_v42 = vadd.f32 %v1495_v62, %v1467_v32  ;;  %v1410_v24 = vpop.f32.mrf.mxu1  ;;  %1776 = vmatpush.bf16.msra.mxu2 %v3035_v9  ;;  %v3688_v32 = vld [vmem:[%s5591_s1 + $0x1a8] sm:$0xf0]  ;;  %1805 = vmatpush.bf16.msra.mxu3 %v3131_v38  ;;  %v3742_v62 = vld [vmem:[%s5591_s1 + $0x358] sm:$0xf0] }
 0x103   : > { %v1411_v54 = vadd.f32 %v1410_v24, %v1382_v8  ;;  %v3023_v55 = vor.u32 %v3688_v32, %v3022_v41  ;;  %v3119_v8 = vor.u32 %v3712_v34, %v3118_v61  ;;  %v3010_v24 = vld [vmem:[%s5591_s1 + $0x188] sm:$0xf]  ;;  %v3709_v41 = vld [vmem:[%s5591_s1 + $0x250] sm:$0xf0] }
 0x104   : > { %1832 = vmatpush.bf16.msrb.mxu0 %v3251_v40  ;;  %v3106_v40 = vld [vmem:[%s5591_s1 + $0x248] sm:$0xf] }
 0x105   : > { %v1440_v63 = vadd.f32 %v4644_v16, %v1411_v54  ;;  %v3238_v16 = vld [vmem:[%s5591_s1 + $0x350] sm:$0xf]  ;;  %v3011_v54 = vor.u32 %v3685_v27, %v3010_v24  ;;  %v3202_v27 = vld [vmem:[%s5591_s1 + $0x308] sm:$0xf] }
 0x106   : > { %1777 = vmatpush.bf16.msra.mxu2 %v3023_v55  ;;  %v3239_v9 = vor.u32 %v3742_v62, %v3238_v16  ;;  %1806 = vmatpush.bf16.msra.mxu3 %v3119_v8  ;;  %v3382_v55 = vld [vmem:[%s5591_s1 + $0x470] sm:$0xf]  ;;  %v3736_v16 = vld [vmem:[%s5591_s1 + $0x328] sm:$0xf0]  ;;  %v1387_v8 = vadd.f32 %v4683_v49, %v4729_v37 }
 0x107   : > { %v1469_v7 = vadd.f32 %v4646_v18, %v1440_v63  ;;  %v1385_v18 = vadd.f32 %v4650_v26, %v4729_v37  ;;  %v3226_v26 = vld [vmem:[%s5591_s1 + $0x338] sm:$0xf]  ;;  %v3107_v63 = vor.u32 %v3709_v41, %v3106_v40  ;;  %v3383_v34 = vor.u32 %v3778_v25, %v3382_v55  ;;  %v3775_v40 = vld [vmem:[%s5591_s1 + $0x460] sm:$0xf0] }
 0x108   : > { %1833 = vmatpush.bf16.msrb.mxu0 %v3239_v9  ;;  %v3227_v0 = vor.u32 %v3739_v58, %v3226_v26 }
 0x109   : > { %v1497_v28 = vpop.f32.mrf.mxu2  ;;  %1858 = vmatpush.bf16.msrb.mxu1 %v3383_v34 }
 0x10a   : > { %v4923_v36 = vpop.f32.mrf.mxu3  ;;  %v4925_v38 = vadd.f32 %v1497_v28, %v1469_v7  ;;  %v1413_v39 = vpop.f32.mrf.mxu1  ;;  %1778 = vmatpush.bf16.msra.mxu2 %v3011_v54  ;;  %1807 = vmatpush.bf16.msra.mxu3 %v3107_v63 }
 0x10b   : > { %v1414_v32 = vadd.f32 %v1413_v39, %v1385_v18  ;;  %v3733_v18 = vld [vmem:[%s5591_s1 + $0x310] sm:$0xf0]  ;;  %v3370_v39 = vld [vmem:[%s5591_s1 + $0x458] sm:$0xf] }
 0x10c   : > { %1834 = vmatpush.bf16.msrb.mxu0 %v3227_v0  ;;  %v3203_v54 = vor.u32 %v3733_v18, %v3202_v27  ;;  %v3371_v26 = vor.u32 %v3775_v40, %v3370_v39  ;;  %v3766_v39 = vld [vmem:[%s5591_s1 + $0x418] sm:$0xf0] }
 0x10d   : > { %v1443_v3 = vadd.f32 %v4679_v47, %v1414_v32  ;;  %1644 = vmatmul.bf16.gmra.mxu1 %v4232_v45  ;;  %v3214_v47 = vld [vmem:[%s5591_s1 + $0x320] sm:$0xf]  ;;  %v1390_v32 = vadd.f32 %v4705_v15, %v4729_v37  ;;  %v3772_v15 = vld [vmem:[%s5591_s1 + $0x448] sm:$0xf0] }
 0x10e   : > { %1673 = vmatmul.bf16.gmra.mxu2 %v4418_v33  ;;  %v3215_v7 = vor.u32 %v3736_v16, %v3214_v47  ;;  %1859 = vmatpush.bf16.msrb.mxu1 %v3371_v26 }
 0x10f   : > { %1702 = vmatmul.bf16.gmra.mxu3 %v4648_v19  ;;  %v1472_v61 = vadd.f32 %v4681_v48, %v1443_v3 }
 0x110   : > { %1835 = vmatpush.bf16.msrb.mxu0 %v3215_v7 }
 0x111   : > { %v1500_v62 = vpop.f32.mrf.mxu2 }
 0x112   : > { %v4959_v9 = vpop.f32.mrf.mxu3  ;;  %v4961_v48 = vadd.f32 %v1500_v62, %v1472_v61  ;;  %v1415_v24 = vpop.f32.mrf.mxu1  ;;  %v3346_v62 = vld [vmem:[%s5591_s1 + $0x428] sm:$0xf] }
 0x113   : > { %v1416_v28 = vadd.f32 %v1415_v24, %v1387_v8 }
 0x114   : > { %1836 = vmatpush.bf16.msrb.mxu0 %v3203_v54  ;;  %v3794_v54 = vld [vmem:[%s5593_s3 + $0x74] sm:$0xf0] }
 0x115   : > { %v1445_v49 = vadd.f32 %v4699_v12, %v1416_v28 }
 0x117   : > { %v1474_v41 = vadd.f32 %v4701_v13, %v1445_v49  ;;  %1837 = vmatmul.bf16.vlgmr.msrb.gmra.mxu0 %v4282_v11  ;;  %v3358_v13 = vld [vmem:[%s5591_s1 + $0x440] sm:$0xf]  ;;  %v5024_v49 = vperm.slane %v4724_v17, 1 }
 0x118   : > { %v3359_v11 = vor.u32 %v3772_v15, %v3358_v13  ;;  %v3426_v13 = vld [vmem:[%s5593_s3 + $0x50] sm:$0xf]  ;;  %v3790_v15 = vld [vmem:[%s5593_s3 + $0x54] sm:$0xf0] }
 0x119   : > { %v1502_v63 = vpop.f32.mrf.mxu2 }
 0x11a   : > { %v4979_v58 = vpop.f32.mrf.mxu3  ;;  %v4981_v12 = vadd.f32 %v1502_v63, %v1474_v41  ;;  %v1418_v0 = vpop.f32.mrf.mxu1  ;;  %1860 = vmatpush.bf16.msrb.mxu1 %v3359_v11  ;;  %v3427_v11 = vor.u32 %v3790_v15, %v3426_v13 }
 0x11b   : > { %v1419_v3 = vadd.f32 %v1418_v0, %v1390_v32 }
 0x11d   : > { %v1448_v55 = vadd.f32 %v4717_v29, %v1419_v3  ;;  %1649 = vmatmul.bf16.gmra.mxu1 %v4259_v60  ;;  %v1392_v29 = vadd.f32 %v4726_v35, %v4729_v37 }
 0x11e   : > { %1678 = vmatmul.bf16.gmra.mxu2 %v4447_v53 }
 0x11f   : > { %1707 = vmatmul.bf16.gmra.mxu3 %v4703_v14  ;;  %v1477_v25 = vadd.f32 %v4719_v30, %v1448_v55  ;;  %v3769_v30 = vld [vmem:[%s5591_s1 + $0x430] sm:$0xf0] }
 0x120   : > { %v3347_v37 = vor.u32 %v3769_v30, %v3346_v62 }
 0x121   : > { %v1505_v61 = vpop.f32.mrf.mxu2 }
 0x122   : > { %v4997_v34 = vpop.f32.mrf.mxu3  ;;  %v4999_v47 = vadd.f32 %v1505_v61, %v1477_v25  ;;  %v1420_v16 = vpop.f32.mrf.mxu1  ;;  %1861 = vmatpush.bf16.msrb.mxu1 %v3347_v37  ;;  %v3418_v61 = vld [vmem:[%s5593_s3 + $0x40] sm:$0xf]  ;;  %v3786_v37 = vld [vmem:[%s5593_s3 + $0x34] sm:$0xf0] }
 0x123   : > { %v1421_v7 = vadd.f32 %v1420_v16, %v1392_v29  ;;  %v3788_v16 = vld [vmem:[%s5593_s3 + $0x44] sm:$0xf0] }
 0x124   : > { %v3419_v62 = vor.u32 %v3788_v16, %v3418_v61  ;;  %v3386_v61 = vld [vmem:[%s5593_s3] sm:$0xf]  ;;  %v3780_v16 = vld [vmem:[%s5593_s3 + $0x4] sm:$0xf0] }
 0x125   : > { %v1450_v8 = vadd.f32 %v4739_v43, %v1421_v7  ;;  %v3442_v43 = vld [vmem:[%s5593_s3 + $0x70] sm:$0xf] }
 0x127   : > { %v1479_v35 = vadd.f32 %v4741_v46, %v1450_v8  ;;  %1842 = vmatmul.bf16.gmra.mxu0 %v4353_v52  ;;  %v3443_v46 = vor.u32 %v3794_v54, %v3442_v43  ;;  %v3334_v52 = vld [vmem:[%s5591_s1 + $0x410] sm:$0xf] }
 0x128   : > { %v3335_v40 = vor.u32 %v3766_v39, %v3334_v52  ;;  %v3506_v43 = vld [vmem:[%s5593_s3 + $0xf0] sm:$0xf] }
 0x129   : > { %v1507_v24 = vpop.f32.mrf.mxu2  ;;  %2193 = vmatpush.bf16.msrb.mxu2 %v3443_v46  ;;  %v3784_v46 = vld [vmem:[%s5593_s3 + $0x24] sm:$0xf0] }
 0x12a   : > { %v5009_v27 = vpop.f32.mrf.mxu3  ;;  %v5011_v18 = vadd.f32 %v1507_v24, %v1479_v35  ;;  %v1519_v28 = vpop.f32.mrf.mxu1  ;;  %1862 = vmatpush.bf16.msrb.mxu1 %v3335_v40  ;;  %v3410_v35 = vld [vmem:[%s5593_s3 + $0x30] sm:$0xf] }
 0x12b   : > { %v1520_v0 = vadd.f32 %v1519_v28, %v4777_v57  ;;  %v3322_v57 = vld [vmem:[%s5591_s1 + $0x3f8] sm:$0xf]  ;;  %v3411_v24 = vor.u32 %v3786_v37, %v3410_v35  ;;  %v3760_v28 = vld [vmem:[%s5591_s1 + $0x3e8] sm:$0xf0]  ;;  %v3387_v35 = vor.u32 %v3780_v16, %v3386_v61  ;;  %v3793_v61 = vld [vmem:[%s5593_s3 + $0x74] sm:$0xf] }
 0x12c   : > { %v3508_v16 = vld [vmem:[%s5593_s3 + $0xf8] sm:$0xf0] }
 0x12d   : > { %1750 = vmatmul.bf16.vlgmr.msra.gmra.mxu1 %v4280_v10  ;;  %v3434_v10 = vld [vmem:[%s5593_s3 + $0x60] sm:$0xf] }
 0x12e   : > { %1779 = vmatmul.bf16.vlgmr.msra.gmra.mxu2 %v4068_v20  ;;  %v3792_v20 = vld [vmem:[%s5593_s3 + $0x64] sm:$0xf0] }
 0x12f   : > { %1808 = vmatmul.bf16.vlgmr.msra.gmra.mxu3 %v4070_v21  ;;  %v3435_v26 = vor.u32 %v3792_v20, %v3434_v10 }
 0x131   : > { %v1548_v21 = vpop.f32.mrf.mxu2  ;;  %2194 = vmatpush.bf16.msrb.mxu2 %v3435_v26 }
 0x132   : > { %v1606_v41 = vpop.f32.mrf.mxu3  ;;  %v1549_v32 = vadd.f32 %v1548_v21, %v5024_v49  ;;  %v1521_v63 = vpop.f32.mrf.mxu1  ;;  %v3498_v21 = vld [vmem:[%s5593_s3 + $0xe0] sm:$0xf] }
 0x133   : > { %v1522_v3 = vadd.f32 %v1521_v63, %v4821_v5 }
 0x134   : > { %v1578_v55 = vadd.f32 %v4775_v23, %v1549_v32  ;;  %v3763_v23 = vld [vmem:[%s5591_s1 + $0x400] sm:$0xf0] }
 0x135   : > { %v5048_v25 = vpack.c.bf16 %v1522_v3, %v1520_v0  ;;  %v3323_v5 = vor.u32 %v3763_v23, %v3322_v57  ;;  %2195 = vmatpush.bf16.msrb.mxu2 %v3427_v11  ;;  %v3394_v3 = vld [vmem:[%s5593_s3 + $0x10] sm:$0xf]  ;;  %v3806_v23 = vld [vmem:[%s5593_s3 + $0xd4] sm:$0xf0] }
 0x136   : > { %v5050_v29 = vadd.f32 %v1606_v41, %v1578_v55  ;;  %v3808_v41 = vld [vmem:[%s5593_s3 + $0xe4] sm:$0xf0]  ;;  %v3782_v55 = vld [vmem:[%s5593_s3 + $0x14] sm:$0xf0] }
 0x137   : > { %1863 = vmatpush.bf16.msrb.mxu1 %v3323_v5  ;;  %1847 = vmatmul.bf16.gmra.mxu0 %v4418_v33  ;;  %v3310_v33 = vld [vmem:[%s5591_s1 + $0x3e0] sm:$0xf]  ;;  %v3499_v63 = vor.u32 %v3808_v41, %v3498_v21  ;;  %v3395_v15 = vor.u32 %v3782_v55, %v3394_v3  ;;  %v3458_v21 = vld [vmem:[%s5593_s3 + $0x90] sm:$0xf]  ;;  %v3798_v41 = vld [vmem:[%s5593_s3 + $0x94] sm:$0xf0] }
 0x138   : > { %v3311_v54 = vor.u32 %v3760_v28, %v3310_v33  ;;  %v3804_v33 = vld [vmem:[%s5593_s3 + $0xc4] sm:$0xf0] }
 0x139   : > { %v5064_v7 = vpop.f32.mrf.mxu2  ;;  %2196 = vmatpush.bf16.msrb.mxu2 %v3419_v62 }
 0x13a   : > { %v5066_v8 = vpop.f32.mrf.mxu3  ;;  %v1524_v30 = vpop.f32.mrf.mxu1 }
 0x13b   : > { %1864 = vmatpush.bf16.msrb.mxu1 %v3311_v54  ;;  %v1525_v26 = vadd.f32 %v1524_v30, %v4875_v42  ;;  %v3298_v42 = vld [vmem:[%s5591_s1 + $0x3c8] sm:$0xf] }
 0x13d   : > { %1755 = vmatmul.bf16.gmra.mxu1 %v4351_v51  ;;  %2197 = vmatpush.bf16.msrb.mxu2 %v3411_v24  ;;  %v3482_v24 = vld [vmem:[%s5593_s3 + $0xc0] sm:$0xf] }
 0x13e   : > { %1784 = vmatmul.bf16.gmra.mxu2 %v4155_v1  ;;  %v3810_v1 = vld [vmem:[%s5593_s3 + $0xf4] sm:$0xf0]  ;;  %v3483_v28 = vor.u32 %v3804_v33, %v3482_v24  ;;  %v3791_v24 = vld [vmem:[%s5593_s3 + $0x64] sm:$0xf] }
 0x13f   : > { %1813 = vmatmul.bf16.gmra.mxu3 %v4157_v2  ;;  %v3507_v51 = vor.u32 %v3810_v1, %v3506_v43  ;;  %v3402_v2 = vld [vmem:[%s5593_s3 + $0x20] sm:$0xf]  ;;  %v3802_v43 = vld [vmem:[%s5593_s3 + $0xb4] sm:$0xf0]  ;;  %v3807_v33 = vld [vmem:[%s5593_s3 + $0xe4] sm:$0xf] }
 0x140   : > { %v3403_v40 = vor.u32 %v3784_v46, %v3402_v2 }
 0x141   : > { %v1553_v52 = vpop.f32.mrf.mxu2  ;;  %2222 = vmatpush.bf16.msrb.mxu3 %v3507_v51 }
 0x142   : > { %v1611_v39 = vpop.f32.mrf.mxu3  ;;  %v1554_v10 = vadd.f32 %v1553_v52, %v5024_v49  ;;  %v1526_v20 = vpop.f32.mrf.mxu1  ;;  %2198 = vmatpush.bf16.msrb.mxu2 %v3403_v40 }
 0x143   : > { %v1527_v32 = vadd.f32 %v1526_v20, %v4925_v38  ;;  %v3490_v38 = vld [vmem:[%s5593_s3 + $0xd0] sm:$0xf] }
 0x144   : > { %v1583_v0 = vadd.f32 %v4873_v22, %v1554_v10  ;;  %v3757_v22 = vld [vmem:[%s5591_s1 + $0x3d0] sm:$0xf0]  ;;  %v3491_v5 = vor.u32 %v3806_v23, %v3490_v38 }
 0x145   : > { %v5112_v13 = vpack.c.bf16 %v1527_v32, %v1525_v26  ;;  %2223 = vmatpush.bf16.msrb.mxu3 %v3499_v63  ;;  %v3299_v57 = vor.u32 %v3757_v22, %v3298_v42  ;;  %v3796_v63 = vld [vmem:[%s5593_s3 + $0x84] sm:$0xf0] }
 0x146   : > { %v5114_v11 = vadd.f32 %v1611_v39, %v1583_v0  ;;  %2199 = vmatpush.bf16.msrb.mxu2 %v3395_v15 }
 0x147   : > { %1865 = vmatpush.bf16.msrb.mxu1 %v3299_v57  ;;  %1852 = vmatmul.bf16.gmra.mxu0 %v4447_v53  ;;  %v3474_v53 = vld [vmem:[%s5593_s3 + $0xb0] sm:$0xf] }
 0x148   : > { %v3475_v54 = vor.u32 %v3802_v43, %v3474_v53  ;;  %v3500_v43 = vld [vmem:[%s5593_s3 + $0xe8] sm:$0xf0] }
 0x149   : > { %v5134_v62 = vpop.f32.mrf.mxu2  ;;  %2224 = vmatpush.bf16.msrb.mxu3 %v3491_v5 }
 0x14a   : > { %v5136_v30 = vpop.f32.mrf.mxu3  ;;  %v1529_v37 = vpop.f32.mrf.mxu1  ;;  %2200 = vmatpush.bf16.msrb.mxu2 %v3387_v35  ;;  %v1551_v35 = vadd.f32 %v5064_v7, %v5024_v49 }
 0x14d   : > { %1760 = vmatmul.bf16.gmra.mxu1 %v4416_v31  ;;  %2225 = vmatpush.bf16.msrb.mxu3 %v3483_v28  ;;  %v1530_v31 = vadd.f32 %v1529_v37, %v4961_v48  ;;  %v3459_v48 = vor.u32 %v3798_v41, %v3458_v21  ;;  %v3787_v41 = vld [vmem:[%s5593_s3 + $0x44] sm:$0xf] }
 0x14e   : > { %1789 = vmatmul.bf16.gmra.mxu2 %v4230_v44  ;;  %v3466_v44 = vld [vmem:[%s5593_s3 + $0xa0] sm:$0xf] }
 0x14f   : > { %1818 = vmatmul.bf16.gmra.mxu3 %v4232_v45  ;;  %v3800_v45 = vld [vmem:[%s5593_s3 + $0xa4] sm:$0xf0] }
 0x150   : > { %v3467_v39 = vor.u32 %v3800_v45, %v3466_v44  ;;  %v3805_v44 = vld [vmem:[%s5593_s3 + $0xd4] sm:$0xf] }
 0x151   : > { %v1558_v1 = vpop.f32.mrf.mxu2  ;;  %2226 = vmatpush.bf16.msrb.mxu3 %v3475_v54  ;;  %v1580_v54 = vadd.f32 %v4819_v6, %v1551_v35  ;;  %v3492_v6 = vld [vmem:[%s5593_s3 + $0xd8] sm:$0xf0] }
 0x152   : > { %v1616_v51 = vpop.f32.mrf.mxu3  ;;  %v1559_v2 = vadd.f32 %v1558_v1, %v5024_v49  ;;  %v1531_v46 = vpop.f32.mrf.mxu1 }
 0x153   : > { %v1532_v52 = vadd.f32 %v1531_v46, %v4981_v12  ;;  %v3428_v46 = vld [vmem:[%s5593_s3 + $0x58] sm:$0xf0] }
 0x154   : > { %v1588_v40 = vadd.f32 %v4959_v9, %v1559_v2  ;;  %v3450_v9 = vld [vmem:[%s5593_s3 + $0x80] sm:$0xf]  ;;  %v3789_v2 = vld [vmem:[%s5593_s3 + $0x54] sm:$0xf] }
 0x155   : > { %v5164_v10 = vpack.c.bf16 %v1532_v52, %v1530_v31  ;;  %2227 = vmatpush.bf16.msrb.mxu3 %v3467_v39  ;;  %v3451_v0 = vor.u32 %v3796_v63, %v3450_v9  ;;  %v3431_v45 = vor.u32 %v3789_v2, %v3428_v46  ;;  %v1609_v31 = vadd.f32 %v5066_v8, %v1580_v54  ;;  %v3484_v63 = vld [vmem:[%s5593_s3 + $0xc8] sm:$0xf0]  ;;  %v3797_v54 = vld [vmem:[%s5593_s3 + $0x94] sm:$0xf] }
 0x156   : > { %v5166_v20 = vadd.f32 %v1616_v51, %v1588_v40  ;;  %v3503_v51 = vor.u32 %v3807_v33, %v3500_v43  ;;  %v3495_v39 = vor.u32 %v3805_v44, %v3492_v6  ;;  %v3396_v43 = vld [vmem:[%s5593_s3 + $0x18] sm:$0xf0]  ;;  %v1722_v44 = vpop.f32.mrf.mxu0 }
 0x159   : > { %v5174_v26 = vpop.f32.mrf.mxu2  ;;  %2228 = vmatpush.bf16.msrb.mxu3 %v3459_v48  ;;  %v3420_v48 = vld [vmem:[%s5593_s3 + $0x48] sm:$0xf0] }
 0x15a   : > { %v5176_v12 = vpop.f32.mrf.mxu3  ;;  %v1534_v32 = vpop.f32.mrf.mxu1 }
 0x15b   : > { %v1535_v22 = vadd.f32 %v1534_v32, %v4999_v47  ;;  %v3444_v47 = vld [vmem:[%s5593_s3 + $0x78] sm:$0xf0]  ;;  %v3803_v32 = vld [vmem:[%s5593_s3 + $0xc4] sm:$0xf] }
 0x15d   : > { %1765 = vmatmul.bf16.gmra.mxu1 %v4445_v50  ;;  %2229 = vmatpush.bf16.msrb.mxu3 %v3451_v0 }
 0x15e   : > { %1794 = vmatmul.bf16.gmra.mxu2 %v4257_v59 }
 0x15f   : > { %1823 = vmatmul.bf16.gmra.mxu3 %v4259_v60 }
 0x161   : > { %v1563_v3 = vpop.f32.mrf.mxu2 }
 0x162   : > { %v1621_v55 = vpop.f32.mrf.mxu3  ;;  %v1564_v15 = vadd.f32 %v1563_v3, %v5024_v49  ;;  %v1536_v42 = vpop.f32.mrf.mxu1 }
 0x163   : > { %v1537_v38 = vadd.f32 %v1536_v42, %v5011_v18  ;;  %v3447_v18 = vor.u32 %v3793_v61, %v3444_v47  ;;  %v3476_v61 = vld [vmem:[%s5593_s3 + $0xb8] sm:$0xf0]  ;;  %v1556_v47 = vadd.f32 %v5134_v62, %v5024_v49  ;;  %v3799_v62 = vld [vmem:[%s5593_s3 + $0xa4] sm:$0xf] }
 0x164   : > { %v1593_v57 = vadd.f32 %v4997_v34, %v1564_v15  ;;  %v3809_v34 = vld [vmem:[%s5593_s3 + $0xf4] sm:$0xf] }
 0x165   : > { %v5191_v23 = vpack.c.bf16 %v1537_v38, %v1535_v22  ;;  %v3511_v37 = vor.u32 %v3809_v34, %v3508_v16  ;;  %2280 = vmatpush.bf16.msra.mxu1 %v3447_v18  ;;  %v3785_v22 = vld [vmem:[%s5593_s3 + $0x34] sm:$0xf]  ;;  %v3412_v38 = vld [vmem:[%s5593_s3 + $0x38] sm:$0xf0]  ;;  %v3404_v16 = vld [vmem:[%s5593_s3 + $0x28] sm:$0xf0]  ;;  %v1585_v33 = vadd.f32 %v4923_v36, %v1556_v47 }
 0x166   : > { %v5193_v5 = vadd.f32 %v1621_v55, %v1593_v57  ;;  %v3487_v55 = vor.u32 %v3803_v32, %v3484_v63  ;;  %v3801_v57 = vld [vmem:[%s5593_s3 + $0xb4] sm:$0xf]  ;;  %v3460_v36 = vld [vmem:[%s5593_s3 + $0x98] sm:$0xf0] }
 0x167   : > { %2309 = vmatpush.bf16.msra.mxu2 %v3511_v37  ;;  %v3479_v18 = vor.u32 %v3801_v57, %v3476_v61  ;;  %v3463_v46 = vor.u32 %v3797_v54, %v3460_v36  ;;  %v3554_v54 = vld [vmem:[%s5593_s3 + $0x150] sm:$0xf] }
 0x169   : > { %v5195_v50 = vpop.f32.mrf.mxu2 }
 0x16a   : > { %v5197_v59 = vpop.f32.mrf.mxu3  ;;  %v1635_v60 = vpop.f32.mrf.mxu1 }
 0x16b   : > { %2310 = vmatpush.bf16.msra.mxu2 %v3503_v51  ;;  %v1636_v52 = vadd.f32 %v1635_v60, %v5050_v29  ;;  %v3423_v29 = vor.u32 %v3787_v41, %v3420_v48  ;;  %v3415_v60 = vor.u32 %v3785_v22, %v3412_v38  ;;  %v1614_v51 = vadd.f32 %v5136_v30, %v1585_v33  ;;  %v3795_v30 = vld [vmem:[%s5593_s3 + $0x84] sm:$0xf]  ;;  %v3826_v38 = vld [vmem:[%s5593_s3 + $0x174] sm:$0xf0] }
 0x16d   : > { %1866 = vmatmul.bf16.vlgmr.msrb.gmra.mxu1 %v4466_v4  ;;  %v3436_v4 = vld [vmem:[%s5593_s3 + $0x68] sm:$0xf0] }
 0x16e   : > { %2201 = vmatmul.bf16.vlgmr.msrb.gmra.mxu2 %v5048_v25  ;;  %v3439_v7 = vor.u32 %v3791_v24, %v3436_v4  ;;  %v3468_v4 = vld [vmem:[%s5593_s3 + $0xa8] sm:$0xf0] }
 0x16f   : > { %2311 = vmatpush.bf16.msra.mxu2 %v3495_v39 }
 0x170   : > { %2281 = vmatpush.bf16.msra.mxu1 %v3439_v7  ;;  %v3781_v7 = vld [vmem:[%s5593_s3 + $0x14] sm:$0xf] }
 0x171   : > { %v1664_v28 = vpop.f32.mrf.mxu2 }
 0x172   : > { %v1693_v53 = vpop.f32.mrf.mxu3  ;;  %v1637_v1 = vpop.f32.mrf.mxu1  ;;  %v1665_v40 = vadd.f32 %v1664_v28, %v1636_v52  ;;  %v3388_v52 = vld [vmem:[%s5593_s3 + $0x8] sm:$0xf0] }
 0x173   : > { %v1638_v21 = vadd.f32 %v1637_v1, %v1609_v31  ;;  %2312 = vmatpush.bf16.msra.mxu2 %v3487_v55  ;;  %v3399_v1 = vor.u32 %v3781_v7, %v3396_v43  ;;  %v3779_v31 = vld [vmem:[%s5593_s3 + $0x4] sm:$0xf] }
 0x174   : > { %2282 = vmatpush.bf16.msra.mxu1 %v3431_v45  ;;  %v1694_v15 = vadd.f32 %v1693_v53, %v1665_v40  ;;  %v3471_v53 = vor.u32 %v3799_v62, %v3468_v4  ;;  %v3391_v40 = vor.u32 %v3779_v31, %v3388_v52 }
 0x177   : > { %2313 = vmatpush.bf16.msra.mxu2 %v3479_v18 }
 0x178   : > { %2283 = vmatpush.bf16.msra.mxu1 %v3423_v29  ;;  %v1561_v29 = vadd.f32 %v5174_v26, %v5024_v49  ;;  %v3570_v26 = vld [vmem:[%s5593_s3 + $0x170] sm:$0xf] }
 0x179   : > { %v1666_v8 = vpop.f32.mrf.mxu2  ;;  %v3571_v57 = vor.u32 %v3826_v38, %v3570_v26  ;;  %v3821_v26 = vld [vmem:[%s5593_s3 + $0x154] sm:$0xf] }
 0x17a   : > { %v1695_v9 = vpop.f32.mrf.mxu3  ;;  %v1667_v0 = vadd.f32 %v1666_v8, %v1638_v21  ;;  %v1640_v3 = vpop.f32.mrf.mxu1  ;;  %v3452_v21 = vld [vmem:[%s5593_s3 + $0x88] sm:$0xf0]  ;;  %v1590_v55 = vadd.f32 %v4979_v58, %v1561_v29 }
 0x17b   : > { %2314 = vmatpush.bf16.msra.mxu2 %v3471_v53  ;;  %v1641_v2 = vadd.f32 %v1640_v3, %v5114_v11  ;;  %v3455_v32 = vor.u32 %v3795_v30, %v3452_v21  ;;  %2251 = vmatpush.bf16.msra.mxu0 %v3571_v57  ;;  %v3820_v30 = vld [vmem:[%s5593_s3 + $0x144] sm:$0xf0]  ;;  %v3825_v21 = vld [vmem:[%s5593_s3 + $0x174] sm:$0xf] }
 0x17c   : > { %v1696_v42 = vadd.f32 %v1695_v9, %v1667_v0  ;;  %2284 = vmatpush.bf16.msra.mxu1 %v3415_v60  ;;  %v1619_v22 = vadd.f32 %v5176_v12, %v1590_v55 }
 0x17d   : > { %1871 = vmatmul.bf16.gmra.mxu1 %v4545_v56  ;;  %v3783_v56 = vld [vmem:[%s5593_s3 + $0x24] sm:$0xf] }
 0x17e   : > { %v5269_v34 = vpack.c.bf16 %v1696_v42, %v1694_v15  ;;  %2206 = vmatmul.bf16.gmra.mxu2 %v5112_v13  ;;  %v3407_v24 = vor.u32 %v3783_v56, %v3404_v16  ;;  %v5320_v15 = vpop.f32.mrf.mxu0 }
 0x17f   : > { %2315 = vmatpush.bf16.msra.mxu2 %v3463_v46 }
 0x180   : > { %2230 = vmatmul.bf16.vlgmr.msrb.gmra.mxu3 %v5269_v34  ;;  %2285 = vmatpush.bf16.msra.mxu1 %v3407_v24  ;;  %v3824_v24 = vld [vmem:[%s5593_s3 + $0x164] sm:$0xf0] }
 0x181   : > { %v1669_v35 = vpop.f32.mrf.mxu2 }
 0x182   : > { %v1698_v37 = vpop.f32.mrf.mxu3  ;;  %v1642_v28 = vpop.f32.mrf.mxu1  ;;  %v1670_v45 = vadd.f32 %v1669_v35, %v1641_v2 }
 0x183   : > { %v1643_v6 = vadd.f32 %v1642_v28, %v1614_v51  ;;  %2316 = vmatpush.bf16.msra.mxu2 %v3455_v32  ;;  %v5345_v28 = vperm.slane %v4724_v17, 2  ;;  %v3572_v32 = vld [vmem:[%s5593_s3 + $0x178] sm:$0xf0] }
 0x184   : > { %2286 = vmatpush.bf16.msra.mxu1 %v3399_v1  ;;  %v1699_v8 = vadd.f32 %v1698_v37, %v1670_v45  ;;  %v3562_v37 = vld [vmem:[%s5593_s3 + $0x160] sm:$0xf]  ;;  %v3822_v1 = vld [vmem:[%s5593_s3 + $0x154] sm:$0xf0] }
 0x185   : > { %v3563_v4 = vor.u32 %v3824_v24, %v3562_v37  ;;  %v3555_v36 = vor.u32 %v3822_v1, %v3554_v54  ;;  %v3812_v54 = vld [vmem:[%s5593_s3 + $0x104] sm:$0xf0] }
 0x186   : > { %v1727_v16 = vpop.f32.mrf.mxu0 }
 0x187   : > { %2252 = vmatpush.bf16.msra.mxu0 %v3563_v4 }
 0x188   : > { %2287 = vmatpush.bf16.msra.mxu1 %v3391_v40 }
 0x189   : > { %v1671_v39 = vpop.f32.mrf.mxu2 }
 0x18a   : > { %v1700_v11 = vpop.f32.mrf.mxu3  ;;  %v1672_v41 = vadd.f32 %v1671_v39, %v1643_v6  ;;  %v1645_v48 = vpop.f32.mrf.mxu1 }
 0x18b   : > { %2253 = vmatpush.bf16.msra.mxu0 %v3555_v36 }
 0x18c   : > { %v1701_v9 = vadd.f32 %v1700_v11, %v1672_v41  ;;  %v1728_v41 = vadd.f32 %v1727_v16, %v5345_v28  ;;  %v3817_v16 = vld [vmem:[%s5593_s3 + $0x134] sm:$0xf] }
 0x18d   : > { %1876 = vmatmul.bf16.gmra.mxu1 %v4648_v19  ;;  %v1646_v19 = vadd.f32 %v1645_v48, %v5166_v20  ;;  %v1566_v20 = vadd.f32 %v5195_v50, %v5024_v49 }
 0x18e   : > { %v5315_v63 = vpack.c.bf16 %v1701_v9, %v1699_v8  ;;  %2211 = vmatmul.bf16.gmra.mxu2 %v5164_v10  ;;  %v5348_v7 = vpop.f32.mrf.mxu0  ;;  %v3575_v8 = vor.u32 %v3825_v21, %v3572_v32 }
 0x18f   : > { %v1595_v49 = vadd.f32 %v5009_v27, %v1566_v20  ;;  %v1723_v27 = vadd.f32 %v1722_v44, %v5345_v28  ;;  %v3546_v44 = vld [vmem:[%s5593_s3 + $0x140] sm:$0xf]  ;;  %v3540_v20 = vld [vmem:[%s5593_s3 + $0x138] sm:$0xf0] }
 0x190   : > { %2235 = vmatmul.bf16.gmra.mxu3 %v5315_v63  ;;  %v3547_v39 = vor.u32 %v3820_v30, %v3546_v44  ;;  %v3543_v24 = vor.u32 %v3817_v16, %v3540_v20 }
 0x191   : > { %v1674_v0 = vpop.f32.mrf.mxu2  ;;  %v1624_v53 = vadd.f32 %v5197_v59, %v1595_v49  ;;  %2338 = vmatpush.bf16.msra.mxu3 %v3575_v8 }
 0x192   : > { %v1703_v3 = vpop.f32.mrf.mxu3  ;;  %v1647_v42 = vpop.f32.mrf.mxu1  ;;  %v1675_v60 = vadd.f32 %v1674_v0, %v1646_v19  ;;  %2254 = vmatpush.bf16.msra.mxu0 %v3547_v39  ;;  %v3823_v0 = vld [vmem:[%s5593_s3 + $0x164] sm:$0xf]  ;;  %v3816_v19 = vld [vmem:[%s5593_s3 + $0x124] sm:$0xf0] }
 0x193   : > { %v1648_v61 = vadd.f32 %v1647_v42, %v1619_v22  ;;  %v3530_v22 = vld [vmem:[%s5593_s3 + $0x120] sm:$0xf] }
 0x194   : > { %v1704_v12 = vadd.f32 %v1703_v3, %v1675_v60  ;;  %v3564_v3 = vld [vmem:[%s5593_s3 + $0x168] sm:$0xf0]  ;;  %v3531_v38 = vor.u32 %v3816_v19, %v3530_v22  ;;  %v3819_v60 = vld [vmem:[%s5593_s3 + $0x144] sm:$0xf] }
 0x195   : > { %v3567_v42 = vor.u32 %v3823_v0, %v3564_v3 }
 0x196   : > { %v1732_v11 = vpop.f32.mrf.mxu0 }
 0x197   : > { %2339 = vmatpush.bf16.msra.mxu3 %v3567_v42 }
 0x199   : > { %v1676_v47 = vpop.f32.mrf.mxu2 }
 0x19a   : > { %v1705_v58 = vpop.f32.mrf.mxu3  ;;  %v1677_v18 = vadd.f32 %v1676_v47, %v1648_v61  ;;  %v1650_v56 = vpop.f32.mrf.mxu1  ;;  %v3548_v61 = vld [vmem:[%s5593_s3 + $0x148] sm:$0xf0] }
 0x19b   : > { %v1651_v43 = vadd.f32 %v1650_v56, %v5193_v5  ;;  %v3551_v47 = vor.u32 %v3819_v60, %v3548_v61  ;;  %v3814_v56 = vld [vmem:[%s5593_s3 + $0x114] sm:$0xf0] }
 0x19c   : > { %v1706_v62 = vadd.f32 %v1705_v58, %v1677_v18  ;;  %v3522_v18 = vld [vmem:[%s5593_s3 + $0x110] sm:$0xf] }
 0x19d   : > { %1881 = vmatmul.bf16.gmra.mxu1 %v4703_v14 }
 0x19e   : > { %v5333_v35 = vpack.c.bf16 %v1706_v62, %v1704_v12  ;;  %2216 = vmatmul.bf16.gmra.mxu2 %v5191_v23  ;;  %v5386_v9 = vpop.f32.mrf.mxu0  ;;  %v1733_v12 = vadd.f32 %v1732_v11, %v5345_v28  ;;  %v3523_v62 = vor.u32 %v3814_v56, %v3522_v18 }
 0x1a0   : > { %2240 = vmatmul.bf16.gmra.mxu3 %v5333_v35 }
 0x1a1   : > { %v1679_v33 = vpop.f32.mrf.mxu2 }
 0x1a2   : > { %v1708_v14 = vpop.f32.mrf.mxu3  ;;  %v1652_v50 = vpop.f32.mrf.mxu1  ;;  %v1680_v51 = vadd.f32 %v1679_v33, %v1651_v43  ;;  %v3815_v33 = vld [vmem:[%s5593_s3 + $0x124] sm:$0xf]  ;;  %v3514_v43 = vld [vmem:[%s5593_s3 + $0x100] sm:$0xf] }
 0x1a3   : > { %v1653_v17 = vadd.f32 %v1652_v50, %v1624_v53  ;;  %v3515_v1 = vor.u32 %v3812_v54, %v3514_v43 }
 0x1a4   : > { %v1709_v5 = vadd.f32 %v1708_v14, %v1680_v51  ;;  %v3532_v14 = vld [vmem:[%s5593_s3 + $0x128] sm:$0xf0] }
 0x1a5   : > { %v3535_v50 = vor.u32 %v3815_v33, %v3532_v14 }
 0x1a6   : > { %v1737_v58 = vpop.f32.mrf.mxu0 }
 0x1a9   : > { %v1681_v2 = vpop.f32.mrf.mxu2 }
 0x1aa   : > { %v1710_v46 = vpop.f32.mrf.mxu3  ;;  %v1682_v59 = vadd.f32 %v1681_v2, %v1653_v17  ;;  %v1751_v45 = vpop.f32.mrf.mxu1  ;;  %v3811_v17 = vld [vmem:[%s5593_s3 + $0x104] sm:$0xf]  ;;  %v3516_v2 = vld [vmem:[%s5593_s3 + $0x108] sm:$0xf0] }
 0x1ab   : > { %v5358_v6 = vadd.f32 %v1751_v45, %v1723_v27  ;;  %v3813_v27 = vld [vmem:[%s5593_s3 + $0x114] sm:$0xf]  ;;  %v1738_v45 = vadd.f32 %v1737_v58, %v5345_v28 }
 0x1ac   : > { %v1711_v31 = vadd.f32 %v1710_v46, %v1682_v59  ;;  %v3519_v46 = vor.u32 %v3811_v17, %v3516_v2 }
 0x1ad   : > { %2288 = vmatmul.bf16.vlgmr.msra.gmra.mxu1 %v5048_v25  ;;  %v3538_v25 = vld [vmem:[%s5593_s3 + $0x130] sm:$0xf] }
 0x1ae   : > { %v5361_v52 = vpack.c.bf16 %v1711_v31, %v1709_v5  ;;  %2317 = vmatmul.bf16.vlgmr.msra.gmra.mxu2 %v5269_v34  ;;  %v3818_v34 = vld [vmem:[%s5593_s3 + $0x134] sm:$0xf0]  ;;  %v5440_v53 = vpop.f32.mrf.mxu0 }
 0x1af   : > { %v3539_v48 = vor.u32 %v3818_v34, %v3538_v25  ;;  %v1725_v34 = vadd.f32 %v5320_v15, %v5345_v28  ;;  %v1730_v15 = vadd.f32 %v5348_v7, %v5345_v28 }
 0x1b0   : > { %2245 = vmatmul.bf16.gmra.mxu3 %v5361_v52 }
 0x1b1   : > { %2255 = vmatpush.bf16.msra.mxu0 %v3539_v48  ;;  %v1780_v37 = vpop.f32.mrf.mxu2 }
 0x1b2   : > { %v5371_v40 = vpop.f32.mrf.mxu1  ;;  %v1809_v59 = vpop.f32.mrf.mxu3  ;;  %v1781_v32 = vadd.f32 %v1780_v37, %v5358_v6 }
 0x1b4   : > { %v1810_v3 = vadd.f32 %v1809_v59, %v1781_v32 }
 0x1b5   : > { %2256 = vmatpush.bf16.msra.mxu0 %v3531_v38 }
 0x1b6   : > { %v1838_v5 = vpop.f32.mrf.mxu0 }
 0x1b7   : > { %v1839_v22 = vadd.f32 %v1838_v5, %v1810_v3 }
 0x1b9   : > { %2257 = vmatpush.bf16.msra.mxu0 %v3523_v62 }
 0x1ba   : > { %v1756_v29 = vpop.f32.mrf.mxu1  ;;  %v1811_v39 = vpop.f32.mrf.mxu3 }
 0x1bb   : > { %v5394_v55 = vadd.f32 %v1756_v29, %v1728_v41  ;;  %v1754_v41 = vadd.f32 %v5371_v40, %v1725_v34 }
 0x1bd   : > { %2293 = vmatmul.bf16.gmra.mxu1 %v5112_v13  ;;  %v3556_v13 = vld [vmem:[%s5593_s3 + $0x158] sm:$0xf0]  ;;  %2258 = vmatpush.bf16.msra.mxu0 %v3515_v1 }
 0x1be   : > { %2322 = vmatmul.bf16.gmra.mxu2 %v5315_v63  ;;  %v3559_v57 = vor.u32 %v3821_v26, %v3556_v13  ;;  %v1840_v11 = vpop.f32.mrf.mxu0 }
 0x1c0   : > { %2340 = vmatpush.bf16.msra.mxu3 %v3559_v57 }
 0x1c2   : > { %v5410_v63 = vpop.f32.mrf.mxu1  ;;  %v1814_v48 = vpop.f32.mrf.mxu3 }
 0x1c3   : > { %v1759_v60 = vadd.f32 %v5410_v63, %v1730_v15  ;;  %v1735_v63 = vadd.f32 %v5386_v9, %v5345_v28 }
 0x1c4   : > { %2341 = vmatpush.bf16.msra.mxu3 %v3551_v47 }
 0x1c6   : > { %v1843_v0 = vpop.f32.mrf.mxu0 }
 0x1c8   : > { %2342 = vmatpush.bf16.msra.mxu3 %v3543_v24 }
 0x1ca   : > { %v1761_v4 = vpop.f32.mrf.mxu1 }
 0x1cb   : > { %v5437_v49 = vadd.f32 %v1761_v4, %v1733_v12 }
 0x1cc   : > { %2343 = vmatpush.bf16.msra.mxu3 %v3535_v50 }
 0x1cd   : > { %2298 = vmatmul.bf16.gmra.mxu1 %v5164_v10  ;;  %v3524_v10 = vld [vmem:[%s5593_s3 + $0x118] sm:$0xf0] }
 0x1ce   : > { %2327 = vmatmul.bf16.gmra.mxu2 %v5333_v35  ;;  %v3527_v36 = vor.u32 %v3813_v27, %v3524_v10  ;;  %v1782_v35 = vpop.f32.mrf.mxu2  ;;  %v1845_v40 = vpop.f32.mrf.mxu0 }
 0x1cf   : > { %v1783_v8 = vadd.f32 %v1782_v35, %v1754_v41 }
 0x1d0   : > { %2344 = vmatpush.bf16.msra.mxu3 %v3527_v36 }
 0x1d1   : > { %v1812_v42 = vadd.f32 %v1811_v39, %v1783_v8 }
 0x1d2   : > { %v1763_v51 = vpop.f32.mrf.mxu1 }
 0x1d3   : > { %v1841_v19 = vadd.f32 %v1840_v11, %v1812_v42  ;;  %v1764_v50 = vadd.f32 %v1763_v51, %v1735_v63  ;;  %v1740_v51 = vadd.f32 %v5440_v53, %v5345_v28 }
 0x1d4   : > { %2345 = vmatpush.bf16.msra.mxu3 %v3519_v46 }
 0x1d6   : > { %v1785_v30 = vpop.f32.mrf.mxu2  ;;  %v1848_v12 = vpop.f32.mrf.mxu0 }
 0x1d7   : > { %v1786_v6 = vadd.f32 %v1785_v30, %v5394_v55 }
 0x1d9   : > { %v1815_v56 = vadd.f32 %v1814_v48, %v1786_v6 }
 0x1da   : > { %v1766_v31 = vpop.f32.mrf.mxu1 }
 0x1db   : > { %v5462_v44 = vadd.f32 %v1766_v31, %v1738_v45  ;;  %v1844_v62 = vadd.f32 %v1843_v0, %v1815_v56 }
 0x1dd   : > { %2303 = vmatmul.bf16.gmra.mxu1 %v5191_v23 }
 0x1de   : > { %2332 = vmatmul.bf16.gmra.mxu2 %v5361_v52  ;;  %v1787_v21 = vpop.f32.mrf.mxu2  ;;  %v1816_v52 = vpop.f32.mrf.mxu3 }
 0x1df   : > { %v1788_v61 = vadd.f32 %v1787_v21, %v1759_v60  ;;  %v1850_v54 = vpop.f32.mrf.mxu0 }
 0x1e1   : > { %v1817_v16 = vadd.f32 %v1816_v52, %v1788_v61  ;;  %v1947_v61 = vld [vmem:[%s5594_s4] sm:$0x3] }
 0x1e2   : > { %v1768_v25 = vpop.f32.mrf.mxu1 }
 0x1e3   : > { %v1846_v20 = vadd.f32 %v1845_v40, %v1817_v16  ;;  %v1769_v31 = vadd.f32 %v1768_v25, %v1740_v51 }
 0x1e6   : > { %v1790_v23 = vpop.f32.mrf.mxu2  ;;  %v1819_v18 = vpop.f32.mrf.mxu3 }
 0x1e7   : > { %v1791_v55 = vadd.f32 %v1790_v23, %v5437_v49  ;;  %v1853_v9 = vpop.f32.mrf.mxu0 }
 0x1e9   : > { %v1820_v27 = vadd.f32 %v1819_v18, %v1791_v55 }
 0x1ea   : > { %v1867_v29 = vpop.f32.mrf.mxu1 }
 0x1eb   : > { %v1868_v38 = vadd.f32 %v1867_v29, %v1839_v22  ;;  %v1849_v17 = vadd.f32 %v1848_v12, %v1820_v27 }
 0x1ee   : > { %v1792_v47 = vpop.f32.mrf.mxu2  ;;  %v1821_v14 = vpop.f32.mrf.mxu3 }
 0x1ef   : > { %v1793_v43 = vadd.f32 %v1792_v47, %v1764_v50  ;;  %v1855_v48 = vpop.f32.mrf.mxu0  ;;  %v5493_v47 = vperm.slane %v1947_v61, 0 }
 0x1f1   : > { %v1822_v10 = vadd.f32 %v1821_v14, %v1793_v43 }
 0x1f2   : > { %v1869_v26 = vpop.f32.mrf.mxu1 }
 0x1f3   : > { %v1870_v13 = vadd.f32 %v1869_v26, %v1841_v19  ;;  %v1851_v2 = vadd.f32 %v1850_v54, %v1822_v10 }
 0x1f5   : > { %v1889_v57 = vpack.c.bf16 %v1870_v13, %v1868_v38 }
 0x1f6   : > { %v1795_v4 = vpop.f32.mrf.mxu2  ;;  %v1824_v35 = vpop.f32.mrf.mxu3 }
 0x1f7   : > { %2259 = vmatmul.bf16.vlgmr.msra.gmra.mxu0 %v1889_v57  ;;  %2346 = vmatmul.bf16.vlgmr.msra.gmra.mxu3 %v1889_v57  ;;  %v1796_v30 = vadd.f32 %v1795_v4, %v5462_v44 }
 0x1f9   : > { %v1825_v21 = vadd.f32 %v1824_v35, %v1796_v30 }
 0x1fa   : > { %v1872_v58 = vpop.f32.mrf.mxu1 }
 0x1fb   : > { %v1873_v24 = vadd.f32 %v1872_v58, %v1844_v62  ;;  %v1854_v32 = vadd.f32 %v1853_v9, %v1825_v21  ;;  %v5498_v62 = vperm.slane %v1947_v61, 1 }
 0x1fe   : > { %v1797_v36 = vpop.f32.mrf.mxu2  ;;  %v1826_v11 = vpop.f32.mrf.mxu3 }
 0x1ff   : > { %v1798_v39 = vadd.f32 %v1797_v36, %v1769_v31 }
 0x201   : > { %v1827_v41 = vadd.f32 %v1826_v11, %v1798_v39 }
 0x202   : > { %v1874_v37 = vpop.f32.mrf.mxu1 }
 0x203   : > { %v1875_v7 = vadd.f32 %v1874_v37, %v1846_v20  ;;  %v1856_v8 = vadd.f32 %v1855_v48, %v1827_v41 }
 0x205   : > { %v1892_v33 = vpack.c.bf16 %v1875_v7, %v1873_v24 }
 0x206   : > { %v2202_v49 = vpop.f32.mrf.mxu2  ;;  %v2231_v25 = vpop.f32.mrf.mxu3 }
 0x207   : > { %2264 = vmatmul.bf16.gmra.mxu0 %v1892_v33  ;;  %2351 = vmatmul.bf16.gmra.mxu3 %v1892_v33  ;;  %v2203_v18 = vadd.f32 %v2202_v49, %v5493_v47 }
 0x209   : > { %v2232_v12 = vadd.f32 %v2231_v25, %v2203_v18  ;;  %v3829_v25 = vld [vmem:[%s5595_s5 + $0x10] sm:$0xff] }
 0x20a   : > { %v1877_v1 = vpop.f32.mrf.mxu1 }
 0x20b   : > { %v1878_v59 = vadd.f32 %v1877_v1, %v1849_v17 }
 0x20e   : > { %v2204_v29 = vpop.f32.mrf.mxu2  ;;  %v2233_v22 = vpop.f32.mrf.mxu3 }
 0x20f   : > { %v2205_v7 = vadd.f32 %v2204_v29, %v5493_v47 }
 0x211   : > { %v2234_v14 = vadd.f32 %v2233_v22, %v2205_v7 }
 0x212   : > { %v1879_v46 = vpop.f32.mrf.mxu1 }
 0x213   : > { %v1880_v45 = vadd.f32 %v1879_v46, %v1851_v2 }
 0x215   : > { %v1895_v5 = vpack.c.bf16 %v1880_v45, %v1878_v59 }
 0x216   : > { %v2207_v53 = vpop.f32.mrf.mxu2  ;;  %v2236_v19 = vpop.f32.mrf.mxu3 }
 0x217   : > { %2269 = vmatmul.bf16.gmra.mxu0 %v1895_v5  ;;  %2356 = vmatmul.bf16.gmra.mxu3 %v1895_v5  ;;  %v2208_v27 = vadd.f32 %v2207_v53, %v5493_v47 }
 0x219   : > { %v2237_v35 = vadd.f32 %v2236_v19, %v2208_v27 }
 0x21a   : > { %v1882_v34 = vpop.f32.mrf.mxu1 }
 0x21b   : > { %v1883_v3 = vadd.f32 %v1882_v34, %v1854_v32 }
 0x21e   : > { %v2209_v23 = vpop.f32.mrf.mxu2  ;;  %v2238_v26 = vpop.f32.mrf.mxu3 }
 0x21f   : > { %v2210_v51 = vadd.f32 %v2209_v23, %v5493_v47 }
 0x221   : > { %v2239_v49 = vadd.f32 %v2238_v26, %v2210_v51 }
 0x222   : > { %v1884_v0 = vpop.f32.mrf.mxu1 }
 0x223   : > { %v1885_v42 = vadd.f32 %v1884_v0, %v1856_v8 }
 0x225   : > { %v1898_v28 = vpack.c.bf16 %v1885_v42, %v1883_v3 }
 0x226   : > { %v2212_v44 = vpop.f32.mrf.mxu2  ;;  %v2241_v13 = vpop.f32.mrf.mxu3 }
 0x227   : > { %2274 = vmatmul.bf16.gmra.mxu0 %v1898_v28  ;;  %2361 = vmatmul.bf16.gmra.mxu3 %v1898_v28  ;;  %v2213_v48 = vadd.f32 %v2212_v44, %v5493_v47  ;;  %v3830_v28 = vld [vmem:[%s5595_s5 + $0x18] sm:$0xff] }
 0x228   : > { %2532 = vmatpush.bf16.msrb.mxu0 %v3830_v28 }
 0x229   : > { %v2242_v29 = vadd.f32 %v2241_v13, %v2213_v48 }
 0x22a   : > { %v2289_v40 = vpop.f32.mrf.mxu1 }
 0x22b   : > { %v2290_v24 = vadd.f32 %v2289_v40, %v5498_v62 }
 0x22c   : > { %2533 = vmatpush.bf16.msrb.mxu0 %v3829_v25 }
 0x22e   : > { %v5480_v52 = vpop.f32.mrf.mxu2  ;;  %v5486_v57 = vpop.f32.mrf.mxu3 }
 0x22f   : > { %v2215_v22 = vadd.f32 %v5480_v52, %v5493_v47  ;;  %v3827_v52 = vld [vmem:[%s5595_s5] sm:$0xff] }
 0x231   : > { %v2244_v13 = vadd.f32 %v5486_v57, %v2215_v22 }
 0x232   : > { %v2291_v58 = vpop.f32.mrf.mxu1 }
 0x233   : > { %v2292_v1 = vadd.f32 %v2291_v58, %v5498_v62 }
 0x236   : > { %v5482_v38 = vpop.f32.mrf.mxu2  ;;  %v5488_v6 = vpop.f32.mrf.mxu3 }
 0x237   : > { %v2218_v57 = vadd.f32 %v5482_v38, %v5493_v47 }
 0x23a   : > { %v2294_v63 = vpop.f32.mrf.mxu1 }
 0x23b   : > { %v2295_v9 = vadd.f32 %v2294_v63, %v5498_v62 }
 0x23e   : > { %v5484_v15 = vpop.f32.mrf.mxu2  ;;  %v5496_v16 = vpop.f32.mrf.mxu3 }
 0x242   : > { %v2296_v2 = vpop.f32.mrf.mxu1 }
 0x243   : > { %v2297_v21 = vadd.f32 %v2296_v2, %v5498_v62 }
 0x246   : > { %v2318_v60 = vpop.f32.mrf.mxu2 }
 0x247   : > { %v2319_v4 = vadd.f32 %v2318_v60, %v2290_v24  ;;  %v3828_v60 = vld [vmem:[%s5595_s5 + $0x8] sm:$0xff] }
 0x248   : > { %2534 = vmatpush.bf16.msrb.mxu0 %v3828_v60 }
 0x24a   : > { %v2299_v34 = vpop.f32.mrf.mxu1 }
 0x24b   : > { %v2300_v53 = vadd.f32 %v2299_v34, %v5498_v62 }
 0x24c   : > { %2535 = vmatpush.bf16.msrb.mxu0 %v3827_v52 }
 0x24e   : > { %v2320_v56 = vpop.f32.mrf.mxu2 }
 0x24f   : > { %v2321_v10 = vadd.f32 %v2320_v56, %v2292_v1 }
 0x252   : > { %v2301_v23 = vpop.f32.mrf.mxu1 }
 0x253   : > { %v2302_v18 = vadd.f32 %v2301_v23, %v5498_v62 }
 0x256   : > { %v2323_v55 = vpop.f32.mrf.mxu2 }
 0x257   : > { %v2324_v5 = vadd.f32 %v2323_v55, %v2295_v9 }
 0x25e   : > { %v2325_v45 = vpop.f32.mrf.mxu2 }
 0x25f   : > { %v2326_v32 = vadd.f32 %v2325_v45, %v2297_v21 }
 0x266   : > { %v2328_v41 = vpop.f32.mrf.mxu2 }
 0x267   : > { %v2329_v44 = vadd.f32 %v2328_v41, %v2300_v53 }
 0x26e   : > { %v2330_v19 = vpop.f32.mrf.mxu2 }
 0x26f   : > { %v2331_v56 = vadd.f32 %v2330_v19, %v2302_v18 }
 0x274   : > { %v2260_v20 = vpop.f32.mrf.mxu0 }
 0x275   : > { %v2261_v37 = vadd.f32 %v2260_v20, %v2232_v12  ;;  %v2304_v12 = vpop.f32.mrf.mxu1 }
 0x276   : > { %v2333_v7 = vpop.f32.mrf.mxu2 }
 0x277   : > { %2367 = vxpose.xlu0.b32.start [1/8] (short) %v2261_v37, 128  ;;  %v2247_v37 = vadd.f32 %v5488_v6, %v2218_v57 }
 0x27a   : > { %v2347_v33 = vpop.f32.mrf.mxu3 }
 0x27b   : > { %v2348_v50 = vadd.f32 %v2347_v33, %v2319_v4  ;;  %v2305_v33 = vadd.f32 %v2304_v12, %v5498_v62 }
 0x27c   : > { %v2262_v43 = vpop.f32.mrf.mxu0 }
 0x27d   : > { %2399 = vxpose.xlu1.b32.start [1/8] (short) %v2348_v50, 128  ;;  %v2263_v54 = vadd.f32 %v2262_v43, %v2234_v14  ;;  %v2220_v14 = vadd.f32 %v5484_v15, %v5493_v47  ;;  %v2334_v50 = vadd.f32 %v2333_v7, %v2305_v33 }
 0x27e   : > { %v2335_v27 = vpop.f32.mrf.mxu2 }
 0x27f   : > { %2368 = vxpose.xlu0.b32.cont [2/8] (short) %v2263_v54, 128  ;;  %v2249_v38 = vadd.f32 %v5496_v16, %v2220_v14  ;;  %v2306_v54 = vpop.f32.mrf.mxu1 }
 0x282   : > { %v2349_v36 = vpop.f32.mrf.mxu3 }
 0x283   : > { %v2350_v17 = vadd.f32 %v2349_v36, %v2321_v10  ;;  %v2307_v10 = vadd.f32 %v2306_v54, %v5498_v62 }
 0x284   : > { %v2265_v46 = vpop.f32.mrf.mxu0 }
 0x285   : > { %v2266_v59 = vadd.f32 %v2265_v46, %v2237_v35  ;;  %2400 = vxpose.xlu1.b32.cont [2/8] (short) %v2350_v17, 128  ;;  %v2336_v36 = vadd.f32 %v2335_v27, %v2307_v10 }
 0x287   : > { %2369 = vxpose.xlu0.b32.cont [3/8] (short) %v2266_v59, 128 }
 0x28a   : > { %v2352_v31 = vpop.f32.mrf.mxu3 }
 0x28b   : > { %v2353_v30 = vadd.f32 %v2352_v31, %v2324_v5 }
 0x28c   : > { %v2267_v39 = vpop.f32.mrf.mxu0 }
 0x28d   : > { %2401 = vxpose.xlu1.b32.cont [3/8] (short) %v2353_v30, 128  ;;  %v2268_v11 = vadd.f32 %v2267_v39, %v2239_v49 }
 0x28f   : > { %2370 = vxpose.xlu0.b32.cont [4/8] (short) %v2268_v11, 128 }
 0x292   : > { %v2354_v8 = vpop.f32.mrf.mxu3 }
 0x293   : > { %v2355_v0 = vadd.f32 %v2354_v8, %v2326_v32 }
 0x294   : > { %v2270_v3 = vpop.f32.mrf.mxu0 }
 0x295   : > { %v2271_v42 = vadd.f32 %v2270_v3, %v2242_v29  ;;  %2402 = vxpose.xlu1.b32.cont [4/8] (short) %v2355_v0, 128 }
 0x297   : > { %2371 = vxpose.xlu0.b32.cont [5/8] (short) %v2271_v42, 128 }
 0x29a   : > { %v2357_v26 = vpop.f32.mrf.mxu3 }
 0x29b   : > { %v2358_v40 = vadd.f32 %v2357_v26, %v2329_v44 }
 0x29c   : > { %v2272_v61 = vpop.f32.mrf.mxu0 }
 0x29d   : > { %2403 = vxpose.xlu1.b32.cont [5/8] (short) %v2358_v40, 128  ;;  %v2273_v58 = vadd.f32 %v2272_v61, %v2244_v13 }
 0x29f   : > { %2372 = vxpose.xlu0.b32.cont [6/8] (short) %v2273_v58, 128 }
 0x2a2   : > { %v2359_v20 = vpop.f32.mrf.mxu3 }
 0x2a3   : > { %v2360_v24 = vadd.f32 %v2359_v20, %v2331_v56 }
 0x2a4   : > { %v2275_v4 = vpop.f32.mrf.mxu0 }
 0x2a5   : > { %v2276_v63 = vadd.f32 %v2275_v4, %v2247_v37  ;;  %2404 = vxpose.xlu1.b32.cont [6/8] (short) %v2360_v24, 128 }
 0x2a7   : > { %2373 = vxpose.xlu0.b32.cont [7/8] (short) %v2276_v63, 128 }
 0x2aa   : > { %v2362_v55 = vpop.f32.mrf.mxu3 }
 0x2ab   : > { %v2363_v43 = vadd.f32 %v2362_v55, %v2334_v50 }
 0x2ac   : > { %v2277_v1 = vpop.f32.mrf.mxu0 }
 0x2ad   : > { %2405 = vxpose.xlu1.b32.cont [7/8] (short) %v2363_v43, 128  ;;  %v2278_v6 = vadd.f32 %v2277_v1, %v2249_v38 }
 0x2af   : > { %2374 = vxpose.xlu0.b32.end [8/8] (short) %v2278_v6, 128 }
 0x2b2   : > { %v2364_v35 = vpop.f32.mrf.mxu3 }
 0x2b3   : > { %v2365_v17 = vadd.f32 %v2364_v35, %v2336_v36 }
 0x2b5   : > { %2406 = vxpose.xlu1.b32.end [8/8] (short) %v2365_v17, 128 }
 0x31b   : > { %v2383_v2 = vpop.trf.xlu0 }
 0x321   : > { %v2415_v48 = vpop.trf.xlu1 }
 0x323   : > { %v2384_v46 = vpop.trf.xlu0 }
 0x324   : > { %v2431_v15 = vpack.c.bf16 %v2384_v46, %v2383_v2 }
 0x326   : > { %3592 = vmatmul.msk.bf16.vlgmr.msrb.gmra.mxu0 %vm2479_vm0, %v2431_v15 }
 0x329   : > { %v2416_v29 = vpop.trf.xlu1 }
 0x32a   : > { %v2439_v22 = vpack.c.bf16 %v2416_v29, %v2415_v48 }
 0x32b   : > { %v2385_v47 = vpop.trf.xlu0 }
 0x331   : > { %v2417_v3 = vpop.trf.xlu1 }
 0x333   : > { %v2386_v16 = vpop.trf.xlu0 }
 0x334   : > { %v2432_v59 = vpack.c.bf16 %v2386_v16, %v2385_v47 }
 0x336   : > { %3593 = vmatmul.msk.bf16.gmra.mxu0 %vm2479_vm0, %v2432_v59 }
 0x339   : > { %v2418_v53 = vpop.trf.xlu1 }
 0x33a   : > { %v2440_v13 = vpack.c.bf16 %v2418_v53, %v2417_v3 }
 0x33b   : > { %v2387_v45 = vpop.trf.xlu0 }
 0x341   : > { %v2419_v23 = vpop.trf.xlu1 }
 0x343   : > { %v2388_v9 = vpop.trf.xlu0 }
 0x344   : > { %v2433_v51 = vpack.c.bf16 %v2388_v9, %v2387_v45 }
 0x346   : > { %3594 = vmatmul.msk.bf16.gmra.mxu0 %vm2479_vm0, %v2433_v51 }
 0x349   : > { %v2420_v19 = vpop.trf.xlu1 }
 0x34a   : > { %v2441_v18 = vpack.c.bf16 %v2420_v19, %v2419_v23 }
 0x34b   : > { %v2389_v62 = vpop.trf.xlu0 }
 0x351   : > { %v2421_v40 = vpop.trf.xlu1 }
 0x353   : > { %v2390_v5 = vpop.trf.xlu0 }
 0x354   : > { %v2434_v31 = vpack.c.bf16 %v2390_v5, %v2389_v62 }
 0x356   : > { %3595 = vmatmul.msk.bf16.gmra.mxu0 %vm2479_vm0, %v2434_v31 }
 0x359   : > { %v2422_v61 = vpop.trf.xlu1 }
 0x35a   : > { %v2442_v12 = vpack.c.bf16 %v2422_v61, %v2421_v40 }
 0x35b   : > { %v2391_v49 = vpop.trf.xlu0 }
 0x361   : > { %v2423_v57 = vpop.trf.xlu1 }
 0x363   : > { %v2392_v30 = vpop.trf.xlu0 }
 0x364   : > { %v2435_v39 = vpack.c.bf16 %v2392_v30, %v2391_v49 }
 0x366   : > { %3596 = vmatmul.msk.bf16.gmra.mxu0 %vm2479_vm0, %v2435_v39 }
 0x369   : > { %v2424_v20 = vpop.trf.xlu1 }
 0x36a   : > { %v2443_v4 = vpack.c.bf16 %v2424_v20, %v2423_v57 }
 0x36b   : > { %v2393_v11 = vpop.trf.xlu0 }
 0x371   : > { %v2425_v24 = vpop.trf.xlu1 }
 0x373   : > { %v2394_v34 = vpop.trf.xlu0 }
 0x374   : > { %v2436_v21 = vpack.c.bf16 %v2394_v34, %v2393_v11 }
 0x376   : > { %3597 = vmatmul.msk.bf16.gmra.mxu0 %vm2479_vm0, %v2436_v21 }
 0x379   : > { %v2426_v63 = vpop.trf.xlu1 }
 0x37a   : > { %v2444_v55 = vpack.c.bf16 %v2426_v63, %v2425_v24 }
 0x37b   : > { %v2395_v41 = vpop.trf.xlu0 }
 0x381   : > { %v2427_v14 = vpop.trf.xlu1 }
 0x383   : > { %v2396_v32 = vpop.trf.xlu0 }
 0x384   : > { %v2437_v8 = vpack.c.bf16 %v2396_v32, %v2395_v41 }
 0x386   : > { %3598 = vmatmul.msk.bf16.gmra.mxu0 %vm2479_vm0, %v2437_v8 }
 0x389   : > { %v2428_v43 = vpop.trf.xlu1 }
 0x38a   : > { %v2445_v1 = vpack.c.bf16 %v2428_v43, %v2427_v14 }
 0x38b   : > { %v2397_v0 = vpop.trf.xlu0 }
 0x391   : > { %v2429_v6 = vpop.trf.xlu1 }
 0x393   : > { %v2398_v42 = vpop.trf.xlu0 }
 0x394   : > { %v2438_v28 = vpack.c.bf16 %v2398_v42, %v2397_v0 }
 0x396   : > { %3599 = vmatmul.msk.bf16.gmra.mxu0 %vm2479_vm0, %v2438_v28 }
 0x399   : > { %v2430_v10 = vpop.trf.xlu1 }
 0x39a   : > { %v2446_v35 = vpack.c.bf16 %v2430_v10, %v2429_v6 }
 0x3a3   : > { %v2537_v25 = vpop.f32.mrf.mxu0 }
 0x3a4   : > { %2617 = vst [vmem:[%s5545_s9] sm:$0xff] %v2537_v25 }
 0x3a6   : > { %3600 = vmatmul.msk.bf16.gmra.mxu0 %vm2479_vm0, %v2439_v22 }
 0x3ab   : > { %v2539_v44 = vpop.f32.mrf.mxu0 }
 0x3ac   : > { %2618 = vst [vmem:[%s5545_s9 + $0x8] sm:$0xff] %v2539_v44 }
 0x3b3   : > { %v2542_v26 = vpop.f32.mrf.mxu0 }
 0x3b4   : > { %2619 = vst [vmem:[%s5545_s9 + $0x10] sm:$0xff] %v2542_v26 }
 0x3b6   : > { %3601 = vmatmul.msk.bf16.gmra.mxu0 %vm2479_vm0, %v2440_v13 }
 0x3bb   : > { %v2544_v60 = vpop.f32.mrf.mxu0 }
 0x3bc   : > { %2620 = vst [vmem:[%s5545_s9 + $0x18] sm:$0xff] %v2544_v60 }
 0x3c3   : > { %v2547_v58 = vpop.f32.mrf.mxu0 }
 0x3c4   : > { %2621 = vst [vmem:[%s5545_s9 + $0x20] sm:$0xff] %v2547_v58 }
 0x3c6   : > { %3602 = vmatmul.msk.bf16.gmra.mxu0 %vm2479_vm0, %v2441_v18 }
 0x3cb   : > { %v2549_v52 = vpop.f32.mrf.mxu0 }
 0x3cc   : > { %2622 = vst [vmem:[%s5545_s9 + $0x28] sm:$0xff] %v2549_v52 }
 0x3d3   : > { %v2552_v56 = vpop.f32.mrf.mxu0 }
 0x3d4   : > { %2623 = vst [vmem:[%s5545_s9 + $0x30] sm:$0xff] %v2552_v56 }
 0x3d6   : > { %3603 = vmatmul.msk.bf16.gmra.mxu0 %vm2479_vm0, %v2442_v12 }
 0x3db   : > { %v2554_v37 = vpop.f32.mrf.mxu0 }
 0x3dc   : > { %2624 = vst [vmem:[%s5545_s9 + $0x38] sm:$0xff] %v2554_v37 }
 0x3e3   : > { %v2557_v7 = vpop.f32.mrf.mxu0 }
 0x3e4   : > { %2625 = vst [vmem:[%s5545_s9 + $0x40] sm:$0xff] %v2557_v7 }
 0x3e6   : > { %3604 = vmatmul.msk.bf16.gmra.mxu0 %vm2479_vm0, %v2443_v4 }
 0x3eb   : > { %v2559_v33 = vpop.f32.mrf.mxu0 }
 0x3ec   : > { %2626 = vst [vmem:[%s5545_s9 + $0x48] sm:$0xff] %v2559_v33 }
 0x3f3   : > { %v2562_v50 = vpop.f32.mrf.mxu0 }
 0x3f4   : > { %2627 = vst [vmem:[%s5545_s9 + $0x50] sm:$0xff] %v2562_v50 }
 0x3f6   : > { %3605 = vmatmul.msk.bf16.gmra.mxu0 %vm2479_vm0, %v2444_v55 }
 0x3fb   : > { %v2564_v38 = vpop.f32.mrf.mxu0 }
 0x3fc   : > { %2628 = vst [vmem:[%s5545_s9 + $0x58] sm:$0xff] %v2564_v38 }
 0x403   : > { %v2567_v54 = vpop.f32.mrf.mxu0 }
 0x404   : > { %2629 = vst [vmem:[%s5545_s9 + $0x60] sm:$0xff] %v2567_v54 }
 0x406   : > { %3606 = vmatmul.msk.bf16.gmra.mxu0 %vm2479_vm0, %v2445_v1 }
 0x40b   : > { %v2569_v27 = vpop.f32.mrf.mxu0 }
 0x40c   : > { %2630 = vst [vmem:[%s5545_s9 + $0x68] sm:$0xff] %v2569_v27 }
 0x413   : > { %v2572_v36 = vpop.f32.mrf.mxu0 }
 0x414   : > { %2631 = vst [vmem:[%s5545_s9 + $0x70] sm:$0xff] %v2572_v36 }
 0x416   : > { %3607 = vmatmul.msk.bf16.gmra.mxu0 %vm2479_vm0, %v2446_v35 }
 0x41b   : > { %v2574_v17 = vpop.f32.mrf.mxu0 }
 0x41c   : > { %2632 = vst [vmem:[%s5545_s9 + $0x78] sm:$0xff] %v2574_v17 }
 0x423   : > { %v2577_v2 = vpop.f32.mrf.mxu0 }
 0x424   : > { %2633 = vst [vmem:[%s5545_s9 + $0x80] sm:$0xff] %v2577_v2 }
 0x42b   : > { %v2579_v46 = vpop.f32.mrf.mxu0 }
 0x42c   : > { %2634 = vst [vmem:[%s5545_s9 + $0x88] sm:$0xff] %v2579_v46 }
 0x433   : > { %v2582_v15 = vpop.f32.mrf.mxu0 }
 0x434   : > { %2635 = vst [vmem:[%s5545_s9 + $0x90] sm:$0xff] %v2582_v15 }
 0x43b   : > { %v2584_v47 = vpop.f32.mrf.mxu0 }
 0x43c   : > { %2636 = vst [vmem:[%s5545_s9 + $0x98] sm:$0xff] %v2584_v47 }
 0x443   : > { %v2587_v16 = vpop.f32.mrf.mxu0 }
 0x444   : > { %2637 = vst [vmem:[%s5545_s9 + $0xa0] sm:$0xff] %v2587_v16 }
 0x44b   : > { %v2589_v59 = vpop.f32.mrf.mxu0 }
 0x44c   : > { %2638 = vst [vmem:[%s5545_s9 + $0xa8] sm:$0xff] %v2589_v59 }
 0x453   : > { %v2592_v45 = vpop.f32.mrf.mxu0 }
 0x454   : > { %2639 = vst [vmem:[%s5545_s9 + $0xb0] sm:$0xff] %v2592_v45 }
 0x45b   : > { %v2594_v9 = vpop.f32.mrf.mxu0 }
 0x45c   : > { %2640 = vst [vmem:[%s5545_s9 + $0xb8] sm:$0xff] %v2594_v9 }
 0x463   : > { %v2597_v51 = vpop.f32.mrf.mxu0 }
 0x464   : > { %2641 = vst [vmem:[%s5545_s9 + $0xc0] sm:$0xff] %v2597_v51 }
 0x46b   : > { %v2599_v62 = vpop.f32.mrf.mxu0 }
 0x46c   : > { %2642 = vst [vmem:[%s5545_s9 + $0xc8] sm:$0xff] %v2599_v62 }
 0x473   : > { %v2602_v5 = vpop.f32.mrf.mxu0 }
 0x474   : > { %2643 = vst [vmem:[%s5545_s9 + $0xd0] sm:$0xff] %v2602_v5 }
 0x47b   : > { %v2604_v31 = vpop.f32.mrf.mxu0 }
 0x47c   : > { %2644 = vst [vmem:[%s5545_s9 + $0xd8] sm:$0xff] %v2604_v31 }
 0x483   : > { %v2607_v49 = vpop.f32.mrf.mxu0 }
 0x484   : > { %2645 = vst [vmem:[%s5545_s9 + $0xe0] sm:$0xff] %v2607_v49 }
 0x48b   : > { %v2609_v30 = vpop.f32.mrf.mxu0 }
 0x48c   : > { %2646 = vst [vmem:[%s5545_s9 + $0xe8] sm:$0xff] %v2609_v30 }
 0x493   : > { %v2612_v39 = vpop.f32.mrf.mxu0 }
 0x494   : > { %2647 = vst [vmem:[%s5545_s9 + $0xf0] sm:$0xff] %v2612_v39 }
 0x49b   : > { %v2614_v11 = vpop.f32.mrf.mxu0 }
 0x49c   : > { %2648 = vst [vmem:[%s5545_s9 + $0xf8] sm:$0xff] %v2614_v11 }
 0x49d PF: > { %s16_s21 = sadd.s32 1, %s3847_s21  }
 0x49e   : > { %p13_p4 = scmp.ge.s32.totalorder %s16_s21, 4  }
 0x4a0   :  { %15 = sbr.rel (!%p13_p4) target bundleno = 1 (0x1), region = 74 }

</bundles_post_ra>
